<compile_context>
chip_gen: v7x
topology: tpu7x:2x2x1
jax: 0.10.0
libtpu: 0.0.40
codegen_flags: <defaults>
</compile_context>

<pallas_src>
import math
import functools

import jax
import jax.numpy as jnp
from jax.experimental import pallas as pl
from jax.experimental.pallas import tpu as pltpu


def gd_transformer_kernel(e_ref, attn_ref, wtok_ref, wmean_ref, gamma_ref,
                          beta_ref, out_ref, *, n_layers, seq_len, b_tile,
                          ln_eps, head_in_kernel, bf16_softmax):
    S, BT = seq_len, b_tile
    M = BT * S

    e = e_ref[0].astype(jnp.float32)          # (M, D)  rows b_local*S + s
    w_tok = wtok_ref[...]                     # (V, D)  bf16 token table
    attn = attn_ref[...]                      # (S+1, S) f32, row 0 == 0
    w_mean = wmean_ref[...]                   # (1, D)  f32 layer-0 expectation
    D = e.shape[1]

    # Hoisted once per grid step: broadcast attention for the batched update.
    attn_b = jnp.broadcast_to(attn, (BT, S + 1, S))

    def gd_update(error):                     # error: (M, D) f32
        err3 = error.reshape(BT, S, D)
        # 'bqk,bkd->bqd' : update for positions 0..S (row 0 stays zero).
        return jax.lax.dot_general(
            attn_b, err3,
            dimension_numbers=(((2,), (1,)), ((0,), (0,))),
            preferred_element_type=jnp.float32)          # (BT, S+1, D)

    def expectation(f_tok):                   # f_tok: (M, D) f32
        logits = jax.lax.dot_general(          # f_tok @ W_tok.T
            f_tok.astype(jnp.bfloat16), w_tok,
            dimension_numbers=(((1,), (1,)), ((), ())),
            preferred_element_type=jnp.float32)          # (M, V) f32
        logits = logits - jnp.max(logits, axis=-1, keepdims=True)
        if bf16_softmax:
            # v6e/v7x: elementwise/exp pass in bf16 (packed vregs, bf16 EUP).
            g = jnp.exp(logits.astype(jnp.bfloat16))
            denom = jnp.sum(g.astype(jnp.float32), axis=-1, keepdims=True)
        else:
            # v5e-safe / max accuracy path: f32 exp, f32 denom.
            g = jnp.exp(logits)
            denom = jnp.sum(g, axis=-1, keepdims=True)
        numer = jnp.dot(g.astype(jnp.bfloat16), w_tok,
                        preferred_element_type=jnp.float32)  # (M, D) f32
        return numer / (denom + 1e-8)          # exact divide (no approx recip)

    # ---- layer 0: f == 0  =>  expectation is the uniform W_tok mean ----------
    f3 = gd_update(e - w_mean)                # (BT, S+1, D) f32

    # ---- layers 1 .. n_layers-1 ----------------------------------------------
    def layer(f):
        f_tok = f[:, :S, :].reshape(M, D)
        return f + gd_update(e - expectation(f_tok))

    if n_layers - 1 <= 4:                     # unroll small layer counts
        for _ in range(n_layers - 1):
            f3 = layer(f3)
    else:                                     # bound live ranges for deep stacks
        f3 = jax.lax.fori_loop(1, n_layers, lambda _, f: layer(f), f3)

    # ---- LayerNorm of the final (N+1-th) position (all inference consumes) ---
    f_last = f3[:, S, :]                      # (BT, D) f32
    mean = jnp.mean(f_last, axis=-1, keepdims=True)
    var = jnp.mean((f_last - mean) ** 2, axis=-1, keepdims=True)
    f_norm = (f_last - mean) * jax.lax.rsqrt(var + ln_eps)
    f_norm = f_norm * gamma_ref[...] + beta_ref[...]

    if head_in_kernel:
        # Tied head in-kernel: lane-dense (BT, V) store (used when D < 128).
        out_ref[...] = jax.lax.dot_general(
            f_norm.astype(jnp.bfloat16), w_tok,
            dimension_numbers=(((1,), (1,)), ((), ())),
            preferred_element_type=jnp.float32)
    else:
        # D >= 128: emit normalized rows; the head runs as one big XLA matmul.
        out_ref[...] = f_norm


def _round8(x):
    return max(8, ((x + 7) // 8) * 8)


def _pick_batch_tile(B, S):
    """Fold batch so M = S*BT approaches the 256-high MXU (v6e/v7x), keep BT a
    multiple of 8 (sublanes), and prefer >= 2 tiles so the 'parallel' grid axis
    can load-balance across v7x's two TensorCores."""
    bt_ideal = _round8(pl.cdiv(256, S))
    b8 = _round8(B)
    if b8 >= 2 * bt_ideal:
        return bt_ideal
    if b8 >= 16:
        return _round8(b8 // 2)
    return b8


def _vmem_limit_bytes():
    # ~3/4 of physical VMEM: ~48 MiB on v7x (64 MiB), ~96 MiB on v5e/v6e (128).
    try:
        return int(pltpu.get_tpu_info().vmem_capacity_bytes * 3 // 4)
    except Exception:
        return 64 * 1024 * 1024


def _const_spec(shape, single_buffer):
    """BlockSpec for a grid-constant operand; single-buffered when requested."""
    index_map = lambda t: (0,) * len(shape)
    if single_buffer:
        return pl.BlockSpec(shape, index_map, pipeline_mode=pl.Buffered(1))
    return pl.BlockSpec(shape, index_map)


def gd_transformer_forward(tokens, params, n_layers, *, batch_tile=None,
                           e_dtype=jnp.float32, bf16_softmax=False,
                           single_buffer_consts=True):
    """tokens: (B, S) int32 -> logits (B, V) from the final output position."""
    B, S = tokens.shape
    w_tok = params["token_embed"]             # (V, D) f32
    w_pos = params["pos_embed"]               # (max_seq_len+1, D)
    V, D = w_tok.shape

    BT = batch_tile if batch_tile is not None else _pick_batch_tile(B, S)
    pad = (-B) % BT
    if pad:
        tokens = jnp.concatenate(
            [tokens, jnp.zeros((pad, S), tokens.dtype)], axis=0)
    Bp = B + pad
    n_tiles = Bp // BT
    M = BT * S

    # Glue (plain JAX): embedding gather + batch-major tile layout (row = b*S+s).
    # e is the only per-step streamed input; e_dtype=bfloat16 halves its DMA
    # (kept f32 by default -- the low mantissa bits feed e - expectation).
    e_r = jnp.take(w_tok, tokens, axis=0).reshape(n_tiles, M, D).astype(e_dtype)

    # Batch-invariant causal-softmax attention, hoisted out of the kernel
    # (identical at every layer in eval mode).  Prepend a zero row so the
    # batched update matmul directly yields the (S+1)-position increment
    # (absorbs the "f[:, 1:S+1] +=" shift).  Stays f32.
    keys = w_pos[:S] @ params["w_k"].T                       # keys:    pos 0..S-1
    queries = w_pos[1:S + 1] @ params["w_q"].T               # queries: pos 1..S
    scores = (queries @ keys.T) * (1.0 / math.sqrt(D))
    scores = jnp.where(jnp.triu(jnp.ones((S, S), bool), k=1), -jnp.inf, scores)
    attn = jax.nn.softmax(scores, axis=-1)                   # (S, S) f32
    attn_full = jnp.concatenate([jnp.zeros((1, S), attn.dtype), attn], axis=0)

    w_tok_bf = w_tok.astype(jnp.bfloat16)                    # MXU operand
    # Layer-0 shortcut: expectation of an all-zero latent state.
    w_mean = (jnp.sum(w_tok, axis=0, keepdims=True)
              / (V + 1e-8)).astype(jnp.float32)              # (1, D) f32

    head_in_kernel = D < 128          # lane-dense (BT, V) slab; else hoist head
    out_width = V if head_in_kernel else D

    kernel = functools.partial(
        gd_transformer_kernel, n_layers=n_layers, seq_len=S, b_tile=BT,
        ln_eps=1e-5, head_in_kernel=head_in_kernel, bf16_softmax=bf16_softmax)

    # TODO(synk): for vocabularies where the (M, V) f32 logits tile plus W_tok
    # no longer fit VMEM (mandatory on v7x's 64 MiB), add an innermost
    # "arbitrary" grid axis over V-tiles of W_tok with an online-softmax
    # (running max / numer / denom) expectation.
    def build(single_buffer):
        return pl.pallas_call(
            kernel,
            out_shape=jax.ShapeDtypeStruct((Bp, out_width), jnp.float32),
            grid=(n_tiles,),
            in_specs=[
                pl.BlockSpec((1, M, D), lambda t: (t, 0, 0)),   # e (streamed)
                _const_spec((S + 1, S), single_buffer),         # attention f32
                _const_spec((V, D), single_buffer),             # W_tok bf16
                _const_spec((1, D), single_buffer),             # layer-0 mean
                _const_spec((1, D), single_buffer),             # gamma
                _const_spec((1, D), single_buffer),             # beta
            ],
            out_specs=pl.BlockSpec((BT, out_width), lambda t: (t, 0)),
            compiler_params=pltpu.CompilerParams(
                dimension_semantics=("parallel",),
                vmem_limit_bytes=_vmem_limit_bytes()),
        )(e_r, attn_full, w_tok_bf, w_mean,
          params["ln_gamma"], params["ln_beta"])

    if single_buffer_consts:
        try:
            out = build(True)
        except Exception:
            # pipeline_mode=pl.Buffered(1) unsupported on this jax version;
            # fall back to default double-buffered constant operands.
            out = build(False)
    else:
        out = build(False)

    if not head_in_kernel:
        out = out @ w_tok.T                                   # (Bp, V) in XLA
    return out[:B]                                            # (B, V)


def init_params(key, vocab_size, d_model, max_seq_len):
    """Deterministic synthetic weights matching the PyTorch _init_weights."""
    k1, k2, k3, k4 = jax.random.split(key, 4)
    tok = 0.02 * jax.random.normal(k1, (vocab_size, d_model), jnp.float32)
    pos = 0.02 * jax.random.normal(k2, (max_seq_len + 1, d_model), jnp.float32)
    bound = math.sqrt(6.0 / (d_model + d_model))   # xavier_uniform
    w_q = jax.random.uniform(k3, (d_model, d_model), jnp.float32, -bound, bound)
    w_k = jax.random.uniform(k4, (d_model, d_model), jnp.float32, -bound, bound)
    return dict(
        token_embed=tok, pos_embed=pos, w_q=w_q, w_k=w_k,
        ln_gamma=jnp.ones((1, d_model), jnp.float32),
        ln_beta=jnp.zeros((1, d_model), jnp.float32))


def reference_forward(tokens, params, n_layers):
    """Pure-JAX f32 reference mirroring the PyTorch forward (no targets)."""
    B, S = tokens.shape
    w_tok = params["token_embed"]
    D = w_tok.shape[1]
    e = jnp.take(w_tok, tokens, axis=0)
    p = jnp.broadcast_to(params["pos_embed"][:S + 1][None], (B, S + 1, D))
    keys = p[:, :S] @ params["w_k"].T
    queries = p[:, 1:S + 1] @ params["w_q"].T
    scores = jnp.einsum("bqd,bkd->bqk", queries, keys) / math.sqrt(D)
    mask = jnp.triu(jnp.ones((S, S), bool), k=1)
    scores = jnp.where(mask, -jnp.inf, scores)
    attn = jax.nn.softmax(scores, axis=-1)
    f = jnp.zeros((B, S + 1, D), jnp.float32)
    for _ in range(n_layers):
        ft = f[:, :S]
        logits = ft @ w_tok.T
        logits = logits - logits.max(-1, keepdims=True)
        g = jnp.exp(logits)
        e_w = (g @ w_tok) / (g.sum(-1, keepdims=True) + 1e-8)
        upd = jnp.einsum("bqk,bkd->bqd", attn, e - e_w)
        f = f.at[:, 1:S + 1].add(upd)
    mean = f.mean(-1, keepdims=True)
    var = ((f - mean) ** 2).mean(-1, keepdims=True)
    fn = (f - mean) / jnp.sqrt(var + 1e-5)
    fn = fn * params["ln_gamma"][0] + params["ln_beta"][0]
    return fn[:, -1] @ w_tok.T


if __name__ == "__main__":
    # Small config consistent with the module (V multiple of 128 for a
    # lane-dense in-kernel output head; D < 128 keeps the head in-kernel).
    vocab_size, d_model, max_seq_len, n_layers = 128, 32, 16, 2
    B, S = 16, 8

    key = jax.random.PRNGKey(0)
    pkey, tkey = jax.random.split(key)
    params = init_params(pkey, vocab_size, d_model, max_seq_len)
    tokens = jax.random.randint(tkey, (B, S), 0, vocab_size, dtype=jnp.int32)

    logits = gd_transformer_forward(tokens, params, n_layers)
    logits = jax.block_until_ready(logits)

    ref = jax.block_until_ready(reference_forward(tokens, params, n_layers))
    assert logits.shape == (B, vocab_size)
    assert bool(jnp.all(jnp.isfinite(logits)))
    assert bool(jnp.allclose(logits, ref, atol=5e-3, rtol=5e-3)), (
        "Pallas kernel output mismatch vs pure-JAX reference")

    print("KERNEL_OK")
</pallas_src>

<mosaic_0001>
module attributes {stable_mosaic.version = 11 : i64} {
  func.func @gd_transformer_kernel(%arg0: i32, %arg1: memref<1x64x32xf32, #tpu.memory_space<vmem>>, %arg2: memref<9x8xf32, #tpu.memory_space<vmem>>, %arg3: memref<128x32xbf16, #tpu.memory_space<vmem>>, %arg4: memref<1x32xf32, #tpu.memory_space<vmem>>, %arg5: memref<1x32xf32, #tpu.memory_space<vmem>>, %arg6: memref<1x32xf32, #tpu.memory_space<vmem>>, %arg7: memref<8x128xf32, #tpu.memory_space<vmem>>) attributes {dimension_semantics = [#tpu.dimension_semantics<parallel>], iteration_bounds = array<i64: 2>, scalar_prefetch = 0 : i64, scratch_operands = 0 : i64, tpu.core_type = #tpu.core_type<tc>, window_params = [{transform_indices = @transform_0, window_bounds = array<i64: 1, 64, 32>}, {pipeline_mode = #tpu.pipeline_mode<synchronous>, transform_indices = @transform_1, window_bounds = array<i64: 9, 8>}, {pipeline_mode = #tpu.pipeline_mode<synchronous>, transform_indices = @transform_2, window_bounds = array<i64: 128, 32>}, {pipeline_mode = #tpu.pipeline_mode<synchronous>, transform_indices = @transform_3, window_bounds = array<i64: 1, 32>}, {pipeline_mode = #tpu.pipeline_mode<synchronous>, transform_indices = @transform_4, window_bounds = array<i64: 1, 32>}, {pipeline_mode = #tpu.pipeline_mode<synchronous>, transform_indices = @transform_5, window_bounds = array<i64: 1, 32>}, {transform_indices = @transform_6, window_bounds = array<i64: 8, 128>}]} {
    %c0 = arith.constant 0 : index
    %c0_0 = arith.constant 0 : index
    %c0_1 = arith.constant 0 : index
    %0 = vector.load %arg1[%c0, %c0_0, %c0_1] : memref<1x64x32xf32, #tpu.memory_space<vmem>>, vector<1x64x32xf32>
    %1 = vector.shape_cast %0 : vector<1x64x32xf32> to vector<64x32xf32>
    %c0_2 = arith.constant 0 : index
    %c0_3 = arith.constant 0 : index
    %2 = vector.load %arg3[%c0_2, %c0_3] : memref<128x32xbf16, #tpu.memory_space<vmem>>, vector<128x32xbf16>
    %c0_4 = arith.constant 0 : index
    %c0_5 = arith.constant 0 : index
    %3 = vector.load %arg2[%c0_4, %c0_5] : memref<9x8xf32, #tpu.memory_space<vmem>>, vector<9x8xf32>
    %c0_6 = arith.constant 0 : index
    %c0_7 = arith.constant 0 : index
    %4 = vector.load %arg4[%c0_6, %c0_7] : memref<1x32xf32, #tpu.memory_space<vmem>>, vector<1x32xf32>
    %5 = vector.shape_cast %3 : vector<9x8xf32> to vector<1x9x8xf32>
    %6 = vector.broadcast %5 : vector<1x9x8xf32> to vector<8x9x8xf32>
    %7 = vector.broadcast %4 : vector<1x32xf32> to vector<64x32xf32>
    %8 = arith.subf %1, %7 : vector<64x32xf32>
    %9 = vector.shape_cast %8 : vector<64x32xf32> to vector<8x8x32xf32>
    %cst = arith.constant dense<0.000000e+00> : vector<8x9x32xf32>
    %10 = tpu.matmul %6, %9, %cst {dimension_numbers = #tpu.dot_dimension_numbers<[2], [1], [1], [2], [0, 0, 0, 1, 1, 2], [0], [0]>} : vector<8x9x8xf32>, vector<8x8x32xf32>, vector<8x9x32xf32> -> vector<8x9x32xf32>
    %11 = vector.extract_strided_slice %10 {offsets = [0, 0, 0], sizes = [8, 8, 32], strides = [1, 1, 1]} : vector<8x9x32xf32> to vector<8x8x32xf32>
    %12 = vector.shape_cast %11 : vector<8x8x32xf32> to vector<64x32xf32>
    %13 = arith.truncf %12 : vector<64x32xf32> to vector<64x32xbf16>
    %cst_8 = arith.constant dense<0.000000e+00> : vector<64x128xf32>
    %14 = tpu.matmul %13, %2, %cst_8 {dimension_numbers = #tpu.dot_dimension_numbers<[1], [1], [0], [0], [0, 0, 1, 0], [], []>} : vector<64x32xbf16>, vector<128x32xbf16>, vector<64x128xf32> -> vector<64x128xf32>
    %cst_9 = arith.constant dense<0xFF800000> : vector<64xf32>
    %15 = vector.multi_reduction <maximumf>, %14, %cst_9 [1] : vector<64x128xf32> to vector<64xf32>
    %16 = vector.shape_cast %15 : vector<64xf32> to vector<64x1xf32>
    %17 = vector.broadcast %16 : vector<64x1xf32> to vector<64x128xf32>
    %18 = arith.subf %14, %17 : vector<64x128xf32>
    %19 = math.exp %18 : vector<64x128xf32>
    %cst_10 = arith.constant dense<0.000000e+00> : vector<64xf32>
    %20 = vector.multi_reduction <add>, %19, %cst_10 [1] : vector<64x128xf32> to vector<64xf32>
    %21 = vector.shape_cast %20 : vector<64xf32> to vector<64x1xf32>
    %22 = arith.truncf %19 : vector<64x128xf32> to vector<64x128xbf16>
    %cst_11 = arith.constant dense<0.000000e+00> : vector<64x32xf32>
    %23 = tpu.matmul %22, %2, %cst_11 {dimension_numbers = #tpu.dot_dimension_numbers<[1], [0], [0], [1], [0, 0, 1, 1], [], []>} : vector<64x128xbf16>, vector<128x32xbf16>, vector<64x32xf32> -> vector<64x32xf32>
    %cst_12 = arith.constant 9.99999993E-9 : f32
    %24 = vector.broadcast %cst_12 : f32 to vector<64x1xf32>
    %25 = arith.addf %21, %24 : vector<64x1xf32>
    %26 = vector.broadcast %25 : vector<64x1xf32> to vector<64x32xf32>
    %27 = arith.divf %23, %26 : vector<64x32xf32>
    %28 = arith.subf %1, %27 : vector<64x32xf32>
    %29 = vector.shape_cast %28 : vector<64x32xf32> to vector<8x8x32xf32>
    %cst_13 = arith.constant dense<0.000000e+00> : vector<8x9x32xf32>
    %30 = tpu.matmul %6, %29, %cst_13 {dimension_numbers = #tpu.dot_dimension_numbers<[2], [1], [1], [2], [0, 0, 0, 1, 1, 2], [0], [0]>} : vector<8x9x8xf32>, vector<8x8x32xf32>, vector<8x9x32xf32> -> vector<8x9x32xf32>
    %31 = arith.addf %10, %30 : vector<8x9x32xf32>
    %32 = vector.extract_strided_slice %31 {offsets = [0, 8, 0], sizes = [8, 1, 32], strides = [1, 1, 1]} : vector<8x9x32xf32> to vector<8x1x32xf32>
    %33 = vector.shape_cast %32 : vector<8x1x32xf32> to vector<8x32xf32>
    %cst_14 = arith.constant dense<0.000000e+00> : vector<8xf32>
    %34 = vector.multi_reduction <add>, %33, %cst_14 [1] : vector<8x32xf32> to vector<8xf32>
    %35 = vector.shape_cast %34 : vector<8xf32> to vector<8x1xf32>
    %cst_15 = arith.constant 3.200000e+01 : f32
    %36 = vector.broadcast %cst_15 : f32 to vector<8x1xf32>
    %37 = arith.divf %35, %36 : vector<8x1xf32>
    %38 = vector.broadcast %37 : vector<8x1xf32> to vector<8x32xf32>
    %39 = arith.subf %33, %38 : vector<8x32xf32>
    %40 = arith.mulf %39, %39 : vector<8x32xf32>
    %cst_16 = arith.constant dense<0.000000e+00> : vector<8xf32>
    %41 = vector.multi_reduction <add>, %40, %cst_16 [1] : vector<8x32xf32> to vector<8xf32>
    %42 = vector.shape_cast %41 : vector<8xf32> to vector<8x1xf32>
    %cst_17 = arith.constant 3.200000e+01 : f32
    %43 = vector.broadcast %cst_17 : f32 to vector<8x1xf32>
    %44 = arith.divf %42, %43 : vector<8x1xf32>
    %45 = vector.broadcast %37 : vector<8x1xf32> to vector<8x32xf32>
    %46 = arith.subf %33, %45 : vector<8x32xf32>
    %cst_18 = arith.constant 9.99999974E-6 : f32
    %47 = vector.broadcast %cst_18 : f32 to vector<8x1xf32>
    %48 = arith.addf %44, %47 : vector<8x1xf32>
    %49 = math.rsqrt %48 : vector<8x1xf32>
    %50 = vector.broadcast %49 : vector<8x1xf32> to vector<8x32xf32>
    %51 = arith.mulf %46, %50 : vector<8x32xf32>
    %c0_19 = arith.constant 0 : index
    %c0_20 = arith.constant 0 : index
    %52 = vector.load %arg5[%c0_19, %c0_20] : memref<1x32xf32, #tpu.memory_space<vmem>>, vector<1x32xf32>
    %53 = vector.broadcast %52 : vector<1x32xf32> to vector<8x32xf32>
    %54 = arith.mulf %51, %53 : vector<8x32xf32>
    %c0_21 = arith.constant 0 : index
    %c0_22 = arith.constant 0 : index
    %55 = vector.load %arg6[%c0_21, %c0_22] : memref<1x32xf32, #tpu.memory_space<vmem>>, vector<1x32xf32>
    %56 = vector.broadcast %55 : vector<1x32xf32> to vector<8x32xf32>
    %57 = arith.addf %54, %56 : vector<8x32xf32>
    %58 = arith.truncf %57 : vector<8x32xf32> to vector<8x32xbf16>
    %cst_23 = arith.constant dense<0.000000e+00> : vector<8x128xf32>
    %59 = tpu.matmul %58, %2, %cst_23 {dimension_numbers = #tpu.dot_dimension_numbers<[1], [1], [0], [0], [0, 0, 1, 0], [], []>} : vector<8x32xbf16>, vector<128x32xbf16>, vector<8x128xf32> -> vector<8x128xf32>
    %c0_24 = arith.constant 0 : index
    %c0_25 = arith.constant 0 : index
    %60 = vector.load %arg7[%c0_24, %c0_25] : memref<8x128xf32, #tpu.memory_space<vmem>>, vector<8x128xf32>
    tpu.vector_store %arg7[%c0_24, %c0_25], %59 {strides = array<i32>} : memref<8x128xf32, #tpu.memory_space<vmem>>, vector<8x128xf32>,
    return
  }
  func.func @transform_0(%arg0: i32) -> (i32, i32, i32) {
    %c0_i32 = arith.constant 0 : i32
    %c0_i32_0 = arith.constant 0 : i32
    %c0_i32_1 = arith.constant 0 : i32
    return %arg0, %c0_i32, %c0_i32_0 : i32, i32, i32
  }
  func.func @transform_1(%arg0: i32) -> (i32, i32) {
    %c0_i32 = arith.constant 0 : i32
    %c0_i32_0 = arith.constant 0 : i32
    %c0_i32_1 = arith.constant 0 : i32
    return %c0_i32, %c0_i32_0 : i32, i32
  }
  func.func @transform_2(%arg0: i32) -> (i32, i32) {
    %c0_i32 = arith.constant 0 : i32
    %c0_i32_0 = arith.constant 0 : i32
    %c0_i32_1 = arith.constant 0 : i32
    return %c0_i32, %c0_i32_0 : i32, i32
  }
  func.func @transform_3(%arg0: i32) -> (i32, i32) {
    %c0_i32 = arith.constant 0 : i32
    %c0_i32_0 = arith.constant 0 : i32
    %c0_i32_1 = arith.constant 0 : i32
    return %c0_i32, %c0_i32_0 : i32, i32
  }
  func.func @transform_4(%arg0: i32) -> (i32, i32) {
    %c0_i32 = arith.constant 0 : i32
    %c0_i32_0 = arith.constant 0 : i32
    %c0_i32_1 = arith.constant 0 : i32
    return %c0_i32, %c0_i32_0 : i32, i32
  }
  func.func @transform_5(%arg0: i32) -> (i32, i32) {
    %c0_i32 = arith.constant 0 : i32
    %c0_i32_0 = arith.constant 0 : i32
    %c0_i32_1 = arith.constant 0 : i32
    return %c0_i32, %c0_i32_0 : i32, i32
  }
  func.func @transform_6(%arg0: i32) -> (i32, i32) {
    %c0_i32 = arith.constant 0 : i32
    %c0_i32_0 = arith.constant 0 : i32
    return %arg0, %c0_i32 : i32, i32
  }
}

module attributes {stable_mosaic.version = 11 : i64} {
  func.func @gd_transformer_kernel(%arg0: i32, %arg1: memref<1x64x32xf32, #tpu.memory_space<vmem>>, %arg2: memref<9x8xf32, #tpu.memory_space<vmem>>, %arg3: memref<128x32xbf16, #tpu.memory_space<vmem>>, %arg4: memref<1x32xf32, #tpu.memory_space<vmem>>, %arg5: memref<1x32xf32, #tpu.memory_space<vmem>>, %arg6: memref<1x32xf32, #tpu.memory_space<vmem>>, %arg7: memref<8x128xf32, #tpu.memory_space<vmem>>) attributes {dimension_semantics = [#tpu.dimension_semantics<parallel>], iteration_bounds = array<i64: 2>, scalar_prefetch = 0 : i64, scratch_operands = 0 : i64, tpu.core_type = #tpu.core_type<tc>, window_params = [{transform_indices = @transform_0, window_bounds = array<i64: 1, 64, 32>}, {pipeline_mode = #tpu.pipeline_mode<synchronous>, transform_indices = @transform_1, window_bounds = array<i64: 9, 8>}, {pipeline_mode = #tpu.pipeline_mode<synchronous>, transform_indices = @transform_2, window_bounds = array<i64: 128, 32>}, {pipeline_mode = #tpu.pipeline_mode<synchronous>, transform_indices = @transform_3, window_bounds = array<i64: 1, 32>}, {pipeline_mode = #tpu.pipeline_mode<synchronous>, transform_indices = @transform_4, window_bounds = array<i64: 1, 32>}, {pipeline_mode = #tpu.pipeline_mode<synchronous>, transform_indices = @transform_5, window_bounds = array<i64: 1, 32>}, {transform_indices = @transform_6, window_bounds = array<i64: 8, 128>}]} {
    %c0 = arith.constant 0 : index
    %c0_0 = arith.constant 0 : index
    %c0_1 = arith.constant 0 : index
    %0 = vector.load %arg1[%c0, %c0_0, %c0_1] : memref<1x64x32xf32, #tpu.memory_space<vmem>>, vector<1x64x32xf32>
    %1 = vector.shape_cast %0 : vector<1x64x32xf32> to vector<64x32xf32>
    %c0_2 = arith.constant 0 : index
    %c0_3 = arith.constant 0 : index
    %2 = vector.load %arg3[%c0_2, %c0_3] : memref<128x32xbf16, #tpu.memory_space<vmem>>, vector<128x32xbf16>
    %c0_4 = arith.constant 0 : index
    %c0_5 = arith.constant 0 : index
    %3 = vector.load %arg2[%c0_4, %c0_5] : memref<9x8xf32, #tpu.memory_space<vmem>>, vector<9x8xf32>
    %c0_6 = arith.constant 0 : index
    %c0_7 = arith.constant 0 : index
    %4 = vector.load %arg4[%c0_6, %c0_7] : memref<1x32xf32, #tpu.memory_space<vmem>>, vector<1x32xf32>
    %5 = vector.shape_cast %3 : vector<9x8xf32> to vector<1x9x8xf32>
    %6 = vector.broadcast %5 : vector<1x9x8xf32> to vector<8x9x8xf32>
    %7 = vector.broadcast %4 : vector<1x32xf32> to vector<64x32xf32>
    %8 = arith.subf %1, %7 : vector<64x32xf32>
    %9 = vector.shape_cast %8 : vector<64x32xf32> to vector<8x8x32xf32>
    %cst = arith.constant dense<0.000000e+00> : vector<8x9x32xf32>
    %10 = tpu.matmul %6, %9, %cst {dimension_numbers = #tpu.dot_dimension_numbers<[2], [1], [1], [2], [0, 0, 0, 1, 1, 2], [0], [0]>} : vector<8x9x8xf32>, vector<8x8x32xf32>, vector<8x9x32xf32> -> vector<8x9x32xf32>
    %11 = vector.extract_strided_slice %10 {offsets = [0, 0, 0], sizes = [8, 8, 32], strides = [1, 1, 1]} : vector<8x9x32xf32> to vector<8x8x32xf32>
    %12 = vector.shape_cast %11 : vector<8x8x32xf32> to vector<64x32xf32>
    %13 = arith.truncf %12 : vector<64x32xf32> to vector<64x32xbf16>
    %cst_8 = arith.constant dense<0.000000e+00> : vector<64x128xf32>
    %14 = tpu.matmul %13, %2, %cst_8 {dimension_numbers = #tpu.dot_dimension_numbers<[1], [1], [0], [0], [0, 0, 1, 0], [], []>} : vector<64x32xbf16>, vector<128x32xbf16>, vector<64x128xf32> -> vector<64x128xf32>
    %cst_9 = arith.constant dense<0xFF800000> : vector<64xf32>
    %15 = vector.multi_reduction <maximumf>, %14, %cst_9 [1] : vector<64x128xf32> to vector<64xf32>
    %16 = vector.shape_cast %15 : vector<64xf32> to vector<64x1xf32>
    %17 = vector.broadcast %16 : vector<64x1xf32> to vector<64x128xf32>
    %18 = arith.subf %14, %17 : vector<64x128xf32>
    %19 = math.exp %18 : vector<64x128xf32>
    %cst_10 = arith.constant dense<0.000000e+00> : vector<64xf32>
    %20 = vector.multi_reduction <add>, %19, %cst_10 [1] : vector<64x128xf32> to vector<64xf32>
    %21 = vector.shape_cast %20 : vector<64xf32> to vector<64x1xf32>
    %22 = arith.truncf %19 : vector<64x128xf32> to vector<64x128xbf16>
    %cst_11 = arith.constant dense<0.000000e+00> : vector<64x32xf32>
    %23 = tpu.matmul %22, %2, %cst_11 {dimension_numbers = #tpu.dot_dimension_numbers<[1], [0], [0], [1], [0, 0, 1, 1], [], []>} : vector<64x128xbf16>, vector<128x32xbf16>, vector<64x32xf32> -> vector<64x32xf32>
    %cst_12 = arith.constant 9.99999993E-9 : f32
    %24 = vector.broadcast %cst_12 : f32 to vector<64x1xf32>
    %25 = arith.addf %21, %24 : vector<64x1xf32>
    %26 = vector.broadcast %25 : vector<64x1xf32> to vector<64x32xf32>
    %27 = arith.divf %23, %26 : vector<64x32xf32>
    %28 = arith.subf %1, %27 : vector<64x32xf32>
    %29 = vector.shape_cast %28 : vector<64x32xf32> to vector<8x8x32xf32>
    %cst_13 = arith.constant dense<0.000000e+00> : vector<8x9x32xf32>
    %30 = tpu.matmul %6, %29, %cst_13 {dimension_numbers = #tpu.dot_dimension_numbers<[2], [1], [1], [2], [0, 0, 0, 1, 1, 2], [0], [0]>} : vector<8x9x8xf32>, vector<8x8x32xf32>, vector<8x9x32xf32> -> vector<8x9x32xf32>
    %31 = arith.addf %10, %30 : vector<8x9x32xf32>
    %32 = vector.extract_strided_slice %31 {offsets = [0, 8, 0], sizes = [8, 1, 32], strides = [1, 1, 1]} : vector<8x9x32xf32> to vector<8x1x32xf32>
    %33 = vector.shape_cast %32 : vector<8x1x32xf32> to vector<8x32xf32>
    %cst_14 = arith.constant dense<0.000000e+00> : vector<8xf32>
    %34 = vector.multi_reduction <add>, %33, %cst_14 [1] : vector<8x32xf32> to vector<8xf32>
    %35 = vector.shape_cast %34 : vector<8xf32> to vector<8x1xf32>
    %cst_15 = arith.constant 3.200000e+01 : f32
    %36 = vector.broadcast %cst_15 : f32 to vector<8x1xf32>
    %37 = arith.divf %35, %36 : vector<8x1xf32>
    %38 = vector.broadcast %37 : vector<8x1xf32> to vector<8x32xf32>
    %39 = arith.subf %33, %38 : vector<8x32xf32>
    %40 = arith.mulf %39, %39 : vector<8x32xf32>
    %cst_16 = arith.constant dense<0.000000e+00> : vector<8xf32>
    %41 = vector.multi_reduction <add>, %40, %cst_16 [1] : vector<8x32xf32> to vector<8xf32>
    %42 = vector.shape_cast %41 : vector<8xf32> to vector<8x1xf32>
    %cst_17 = arith.constant 3.200000e+01 : f32
    %43 = vector.broadcast %cst_17 : f32 to vector<8x1xf32>
    %44 = arith.divf %42, %43 : vector<8x1xf32>
    %45 = vector.broadcast %37 : vector<8x1xf32> to vector<8x32xf32>
    %46 = arith.subf %33, %45 : vector<8x32xf32>
    %cst_18 = arith.constant 9.99999974E-6 : f32
    %47 = vector.broadcast %cst_18 : f32 to vector<8x1xf32>
    %48 = arith.addf %44, %47 : vector<8x1xf32>
    %49 = math.rsqrt %48 : vector<8x1xf32>
    %50 = vector.broadcast %49 : vector<8x1xf32> to vector<8x32xf32>
    %51 = arith.mulf %46, %50 : vector<8x32xf32>
    %c0_19 = arith.constant 0 : index
    %c0_20 = arith.constant 0 : index
    %52 = vector.load %arg5[%c0_19, %c0_20] : memref<1x32xf32, #tpu.memory_space<vmem>>, vector<1x32xf32>
    %53 = vector.broadcast %52 : vector<1x32xf32> to vector<8x32xf32>
    %54 = arith.mulf %51, %53 : vector<8x32xf32>
    %c0_21 = arith.constant 0 : index
    %c0_22 = arith.constant 0 : index
    %55 = vector.load %arg6[%c0_21, %c0_22] : memref<1x32xf32, #tpu.memory_space<vmem>>, vector<1x32xf32>
    %56 = vector.broadcast %55 : vector<1x32xf32> to vector<8x32xf32>
    %57 = arith.addf %54, %56 : vector<8x32xf32>
    %58 = arith.truncf %57 : vector<8x32xf32> to vector<8x32xbf16>
    %cst_23 = arith.constant dense<0.000000e+00> : vector<8x128xf32>
    %59 = tpu.matmul %58, %2, %cst_23 {dimension_numbers = #tpu.dot_dimension_numbers<[1], [1], [0], [0], [0, 0, 1, 0], [], []>} : vector<8x32xbf16>, vector<128x32xbf16>, vector<8x128xf32> -> vector<8x128xf32>
    %c0_24 = arith.constant 0 : index
    %c0_25 = arith.constant 0 : index
    %60 = vector.load %arg7[%c0_24, %c0_25] : memref<8x128xf32, #tpu.memory_space<vmem>>, vector<8x128xf32>
    tpu.vector_store %arg7[%c0_24, %c0_25], %59 {strides = array<i32>} : memref<8x128xf32, #tpu.memory_space<vmem>>, vector<8x128xf32>,
    return
  }
  func.func @transform_0(%arg0: i32) -> (i32, i32, i32) {
    %c0_i32 = arith.constant 0 : i32
    %c0_i32_0 = arith.constant 0 : i32
    %c0_i32_1 = arith.constant 0 : i32
    return %arg0, %c0_i32, %c0_i32_0 : i32, i32, i32
  }
  func.func @transform_1(%arg0: i32) -> (i32, i32) {
    %c0_i32 = arith.constant 0 : i32
    %c0_i32_0 = arith.constant 0 : i32
    %c0_i32_1 = arith.constant 0 : i32
    return %c0_i32, %c0_i32_0 : i32, i32
  }
  func.func @transform_2(%arg0: i32) -> (i32, i32) {
    %c0_i32 = arith.constant 0 : i32
    %c0_i32_0 = arith.constant 0 : i32
    %c0_i32_1 = arith.constant 0 : i32
    return %c0_i32, %c0_i32_0 : i32, i32
  }
  func.func @transform_3(%arg0: i32) -> (i32, i32) {
    %c0_i32 = arith.constant 0 : i32
    %c0_i32_0 = arith.constant 0 : i32
    %c0_i32_1 = arith.constant 0 : i32
    return %c0_i32, %c0_i32_0 : i32, i32
  }
  func.func @transform_4(%arg0: i32) -> (i32, i32) {
    %c0_i32 = arith.constant 0 : i32
    %c0_i32_0 = arith.constant 0 : i32
    %c0_i32_1 = arith.constant 0 : i32
    return %c0_i32, %c0_i32_0 : i32, i32
  }
  func.func @transform_5(%arg0: i32) -> (i32, i32) {
    %c0_i32 = arith.constant 0 : i32
    %c0_i32_0 = arith.constant 0 : i32
    %c0_i32_1 = arith.constant 0 : i32
    return %c0_i32, %c0_i32_0 : i32, i32
  }
  func.func @transform_6(%arg0: i32) -> (i32, i32) {
    %c0_i32 = arith.constant 0 : i32
    %c0_i32_0 = arith.constant 0 : i32
    return %arg0, %c0_i32 : i32, i32
  }
}

</mosaic_0001>

<bundles_post_ra>
// kernel: tpu_custom_call.1
= control target key start
LH: loop header
LB: loop body
LE: loop exit
PB: predicated region body
PF: predicated region fallthrough
CT: control target
= control target key end

     0   :  { %11 = vsyncpa [#allocation3], 0  ;;  %s3551_s0 = inlined_call_operand.hbm [shape: f32[2,64,32], index: 0, kind: input, shape index: {}]   ;;  %s3552_s1 = inlined_call_operand.hbm [shape: f32[9,8], index: 1, kind: input, shape index: {}]   ;;  %s3553_s2 = inlined_call_operand.hbm [shape: bf16[128,32], index: 2, kind: input, shape index: {}]   ;;  %s3554_s3 = inlined_call_operand.hbm [shape: f32[1,32], index: 3, kind: input, shape index: {}]   ;;  %s3555_s4 = inlined_call_operand.hbm [shape: f32[1,32], index: 4, kind: input, shape index: {}]   ;;  %s3556_s5 = inlined_call_operand.hbm [shape: f32[1,32], index: 5, kind: input, shape index: {}]   ;;  %s3557_s6 = inlined_call_operand.hbm [shape: f32[16,128], index: 6, kind: output, shape index: {}]  }
   0x1   :  { %13 = vsyncpa [#allocation3 + $0x1], 0 }
   0x2   :  { %14 = vsyncpa [#allocation6], 0 }
   0x3   :  { %15 = vsyncpa [#allocation9], 0 }
   0x4   :  { %16 = vsyncpa [#allocation12], 0 }
   0x5   :  { %17 = vsyncpa [#allocation4], 0 }
   0x6   :  { %19 = vsyncpa [#allocation4 + $0x1], 0  ;;  %s3014_s21 = smov 0   ;;  %s3016_s22 = smov 0  }
   0x7   :  { %s3018_s23 = smov 0   ;;  %s3020_s24 = smov 0  }
   0x8 LB: > { %s2966_s25 = smov [#allocation5]   ;;  %s3035_s27 = sadd.s32 4294967295, %s2964_s24   ;;  %s2964_s24 = sphi %s3020_s24, %s3586_s24   ;;  %s2960_s23 = sphi %s3018_s23, %s3585_s23   ;;  %s2956_s22 = sphi %s3016_s22, %s3584_s22   ;;  %s2952_s21 = sphi %s3014_s21, %s3583_s21  }
   0x9   : > { %s199_s26 = sshll.u32 %s2966_s25, 4  ;;  %p2263_p0 = scmp.ge.s32.totalorder %s2964_s24, 1  ;;  %s3040_s26 = int_to_ptr.vmem [resolvable:$true] %s199_s26 }
   0xa   : > { %p3560_p1 = scmp.eq.s32.totalorder %s3035_s27, 0  ;;  %p187_p2 = scmp.lt.s32.totalorder %s2964_s24, 3 }
   0xb   : > { %s2967_s29 = smov [#allocation8]   ;;  %s2968_s8 = smov [#allocation7]  }
   0xc   : > { %p3042_p3 = pnand %p2263_p0, %p187_p2  ;;  %s226_s30 = sshll.u32 %s2967_s29, 4  ;;  %s3055_s30 = int_to_ptr.vmem [resolvable:$true] %s226_s30 }
   0xd   : > { %s212_s9 = sshll.u32 %s2968_s8, 4  ;;  %s2716_s12 = scalar_lea.hbm %s3552_s1, 256  ;;  %s3057_s9 = int_to_ptr.vmem [resolvable:$true] %s212_s9 }
   0xe   : > { %s3563_s28 = scalar_select %p3042_p3, 1, 0 }
   0xf   : > { %p2595_p5 = pneg %p3042_p3  ;;  %p2717_p7 = scmp.ne.s32.totalorder %s3552_s1, %s2716_s12 }
  0x10   : > { %p2723_p11 = scmp.lt.u32.totalorder %s2716_s12, %s3552_s1 }
  0x11   : > { %p3051_p6 = pnand %p2595_p5, %p3560_p1 }
  0x13   : > { %p3067_p8 = pneg %p3051_p6 }
  0x15   : > { %p2719_p9 = pnand %p3067_p8, %p2717_p7 }
  0x17   : > { %p2720_p10 = pneg %p2719_p9 }
  0x19   : > { %p2725_p12 = pnand %p2723_p11, %p2720_p10 }
  0x1b   : > { %2728 = shalt.err (!%p2725_p12)
}
  0x1c   : > { %s2729_s18 = scalar_lea.vmem %s3040_s26, 256  ;;  %p2737_p5 = scmp.lt.s32.totalorder %s3040_s26, %s3040_s26 }
  0x1d   : > { %p2730_p13 = scmp.ne.s32.totalorder %s3040_s26, %s2729_s18  ;;  %p2738_p4 = scmp.lt.s32.totalorder %s2729_s18, %s2729_s18 }
  0x1f   : > { %p2732_p0 = pnand %p2730_p13, %p3067_p8  ;;  %p2739_p7 = por %p2738_p4, %p2737_p5 }
  0x21   : > { %p2733_p2 = pneg %p2732_p0 }
  0x23   : > { %p2740_p9 = pnand %p2739_p7, %p2733_p2 }
  0x25   : > { %2743 = shalt.err (!%p2740_p9)
}
  0x26   : > { %s3558_s19 = smov 128   ;;  %s3559_s20 = smov 8  }
  0x27   : > { %2598 = dma.hbm_to_vmem [thread:$0]  (!%p3051_p6), %s3552_s1, 256, %s3040_s26, [#allocation6], %s3558_s19, %s3558_s19, %s3559_s20  }
  0x28   : > { %s2744_s11 = scalar_lea.hbm %s3554_s3, 16 }
  0x29   : > { %p2745_p4 = scmp.ne.s32.totalorder %s3554_s3, %s2744_s11  ;;  %p2751_p12 = scmp.lt.u32.totalorder %s2744_s11, %s3554_s3 }
  0x2b   : > { %p2747_p10 = pnand %p2745_p4, %p3067_p8 }
  0x2d   : > { %p2748_p11 = pneg %p2747_p10 }
  0x2f   : > { %p2753_p13 = pnand %p2751_p12, %p2748_p11 }
  0x31   : > { %2756 = shalt.err (!%p2753_p13)
}
  0x32   : > { %s2757_s26 = scalar_lea.vmem %s3055_s30, 16  ;;  %s2764_s17 = scalar_lea.vmem %s3055_s30, 32 }
  0x33   : > { %p2758_p0 = scmp.ne.s32.totalorder %s3055_s30, %s2757_s26  ;;  %p2765_p7 = scmp.lt.s32.totalorder %s3055_s30, %s3055_s30 }
  0x34   : > { %p2766_p9 = scmp.lt.s32.totalorder %s2764_s17, %s2757_s26 }
  0x35   : > { %p2760_p2 = pnand %p2758_p0, %p3067_p8 }
  0x36   : > { %p2767_p4 = por %p2766_p9, %p2765_p7 }
  0x37   : > { %p2761_p5 = pneg %p2760_p2 }
  0x39   : > { %p2768_p10 = pnand %p2767_p4, %p2761_p5 }
  0x3b   : > { %2771 = shalt.err (!%p2768_p10)
}
  0x3c   : > { %2604 = dma.hbm_to_vmem [thread:$0]  (!%p3051_p6), %s3554_s3, 16, %s3055_s30, [#allocation9]  }
  0x3d   : > { %s2772_s10 = scalar_lea.hbm %s3553_s2, 1024 }
  0x3e   : > { %p2773_p11 = scmp.ne.s32.totalorder %s3553_s2, %s2772_s10  ;;  %p2779_p0 = scmp.lt.u32.totalorder %s2772_s10, %s3553_s2 }
  0x40   : > { %p2775_p12 = pnand %p2773_p11, %p3067_p8 }
  0x42   : > { %p2776_p13 = pneg %p2775_p12 }
  0x44   : > { %p2781_p2 = pnand %p2779_p0, %p2776_p13 }
  0x46   : > { %2784 = shalt.err (!%p2781_p2)
}
  0x47   : > { %s2785_s30 = scalar_lea.vmem %s3057_s9, 1024  ;;  %p2793_p4 = scmp.lt.s32.totalorder %s3057_s9, %s3057_s9 }
  0x48   : > { %p2786_p5 = scmp.ne.s32.totalorder %s3057_s9, %s2785_s30  ;;  %p2794_p10 = scmp.lt.s32.totalorder %s2785_s30, %s2785_s30 }
  0x4a   : > { %p2788_p7 = pnand %p2786_p5, %p3067_p8  ;;  %p2795_p11 = por %p2794_p10, %p2793_p4 }
  0x4c   : > { %p2789_p9 = pneg %p2788_p7 }
  0x4e   : > { %p2796_p12 = pnand %p2795_p11, %p2789_p9 }
  0x50   : > { %2799 = shalt.err (!%p2796_p12)
}
  0x51   : > { %s2971_s16 = smov 64   ;;  %s2972_s26 = smov 4  }
  0x52   : > { %2601 = dma.hbm_to_vmem [thread:$0]  (!%p3051_p6), %s3553_s2, 1024, %s3057_s9, [#allocation6], %s2971_s16, %s2971_s16, %s2972_s26  }
  0x53   : > { %s2973_s25 = smov [#allocation10]   ;;  %s2974_s8 = smov [#allocation11]  }
  0x54   : > { %s237_s29 = sshll.u32 %s2973_s25, 4  ;;  %s248_s10 = sshll.u32 %s2974_s8, 4  ;;  %s238_s29 = int_to_ptr.vmem [resolvable:$true] %s237_s29  ;;  %s249_s10 = int_to_ptr.vmem [resolvable:$true] %s248_s10 }
  0x55   : > { %s2800_s13 = scalar_lea.hbm %s3555_s4, 16 }
  0x56   : > { %p2801_p13 = scmp.ne.s32.totalorder %s3555_s4, %s2800_s13  ;;  %p2807_p5 = scmp.lt.u32.totalorder %s2800_s13, %s3555_s4 }
  0x58   : > { %p2803_p0 = pnand %p2801_p13, %p3067_p8 }
  0x5a   : > { %p2804_p2 = pneg %p2803_p0 }
  0x5c   : > { %p2809_p7 = pnand %p2807_p5, %p2804_p2 }
  0x5e   : > { %2812 = shalt.err (!%p2809_p7)
}
  0x5f   : > { %s2813_s9 = scalar_lea.vmem %s238_s29, 16  ;;  %s2820_s16 = scalar_lea.vmem %s238_s29, 32 }
  0x60   : > { %p2814_p9 = scmp.ne.s32.totalorder %s238_s29, %s2813_s9  ;;  %p2821_p11 = scmp.lt.s32.totalorder %s238_s29, %s238_s29 }
  0x61   : > { %p2822_p12 = scmp.lt.s32.totalorder %s2820_s16, %s2813_s9 }
  0x62   : > { %p2816_p4 = pnand %p2814_p9, %p3067_p8 }
  0x63   : > { %p2823_p1 = por %p2822_p12, %p2821_p11 }
  0x64   : > { %p2817_p10 = pneg %p2816_p4 }
  0x66   : > { %p2824_p3 = pnand %p2823_p1, %p2817_p10 }
  0x68   : > { %2827 = shalt.err (!%p2824_p3)
}
  0x69   : > { %2607 = dma.hbm_to_vmem [thread:$0]  (!%p3051_p6), %s3555_s4, 16, %s238_s29, [#allocation9]  }
  0x6a   : > { %s2828_s18 = scalar_lea.hbm %s3556_s5, 16 }
  0x6b   : > { %p2829_p13 = scmp.ne.s32.totalorder %s3556_s5, %s2828_s18  ;;  %p2835_p3 = scmp.lt.u32.totalorder %s2828_s18, %s3556_s5 }
  0x6d   : > { %p2831_p0 = pnand %p2829_p13, %p3067_p8 }
  0x6f   : > { %p2832_p1 = pneg %p2831_p0 }
  0x71   : > { %p2837_p2 = pnand %p2835_p3, %p2832_p1 }
  0x73   : > { %2840 = shalt.err (!%p2837_p2)
}
  0x74   : > { %s2841_s13 = scalar_lea.vmem %s249_s10, 16  ;;  %s2848_s29 = scalar_lea.vmem %s249_s10, 32 }
  0x75   : > { %p2842_p5 = scmp.ne.s32.totalorder %s249_s10, %s2841_s13  ;;  %p2849_p4 = scmp.lt.s32.totalorder %s249_s10, %s249_s10 }
  0x76   : > { %p2850_p10 = scmp.lt.s32.totalorder %s2848_s29, %s2841_s13 }
  0x77   : > { %p2844_p7 = pnand %p2842_p5, %p3067_p8 }
  0x78   : > { %p2851_p11 = por %p2850_p10, %p2849_p4 }
  0x79   : > { %p2845_p9 = pneg %p2844_p7 }
  0x7b   : > { %p2852_p12 = pnand %p2851_p11, %p2845_p9 }
  0x7d   : > { %2855 = shalt.err (!%p2852_p12)
}
  0x7e   : > { %2610 = dma.hbm_to_vmem [thread:$0]  (!%p3051_p6), %s3556_s5, 16, %s249_s10, [#allocation12]  }
  0x7f   : > { %s2262_s15 = sadd.s32 4294967294, %s2964_s24   ;;  %s3176_s7 = sadd.s32 1, %s2964_s24  }
  0x80   : > { %s32_s9 = sadd.s32 1, %s2960_s23  ;;  %s29_s16 = ssub.s32 %s2964_s24, %s3176_s7 }
  0x81   : > { %p39_p8 = scmp.ne.s32.totalorder %s2960_s23, %s2956_s22  ;;  %p30_p13 = scmp.eq.s32.totalorder %s29_s16, 0 }
  0x82   : > { %p40_p0 = scmp.eq.s32.totalorder %s2964_s24, 0  ;;  %p45_p1 = scmp.ne.s32.totalorder %s2956_s22, %s2952_s21 }
  0x83   : > { %p174_p3 = scmp.eq.s32.totalorder %s3035_s27, 1  ;;  %p3566_p5 = scmp.eq.s32.totalorder %s3035_s27, 0 }
  0x84   : > { %s3188_s26 = scalar_select %p30_p13, %s2960_s23, %s32_s9  }
  0x85   : > { %p41_p2 = por %p40_p0, %p39_p8  ;;  %p3192_p7 = por %p3566_p5, %p45_p1 }
  0x86   : > { %p3196_p6 = por %p174_p3, %p39_p8  ;;  %p180_p9 = scmp.eq.s32.totalorder %s2262_s15, 1 }
  0x87   : > { %p2624_p4 = scmp.lt.s32.totalorder %s2964_s24, 2  ;;  %s259_s19 = sand.u32 1, %s2960_s23  }
  0x88   : > { %s3568_s10 = scalar_select %p3196_p6, 1, 0 }
  0x89   : > { %p3202_p10 = por %p180_p9, %p45_p1  ;;  %s2270_s18 = sshll.u32 %s259_s19, 6 }
  0x8a   : > { %s2333_s25 = sshll.u32 %s2964_s24, 10  ;;  %s263_s13 = scalar_lea.vmem [#allocation2], %s2270_s18 }
  0x8b   : > { %s3569_s20 = scalar_select %p3202_p10, 1, 0 }
  0x8c   : > { %s3210_s12 = scalar_lea.hbm %s3551_s0, %s2333_s25  ;;  %s270_s29 = sshll.u32 %s263_s13, 4  ;;  %s3216_s29 = int_to_ptr.vmem [resolvable:$true] %s270_s29 }
  0x8d   : > { %p3212_p11 = pnand %p2624_p4, %p41_p2  ;;  %s3218_s30 = scalar_lea.sflag [#allocation3], %s259_s19 }
  0x8e   : > { %s2856_s15 = scalar_lea.hbm %s3210_s12, 1024  ;;  %s2861_s18 = scalar_lea.hbm %s3551_s0, 2048 }
  0x8f   : > { %p2857_p12 = scmp.ne.s32.totalorder %s3210_s12, %s2856_s15  ;;  %p2858_p8 = pneg %p3212_p11 }
  0x90   : > { %p2862_p1 = scmp.lt.u32.totalorder %s3210_s12, %s3551_s0  ;;  %p2863_p3 = scmp.lt.u32.totalorder %s2861_s18, %s2856_s15 }
  0x91   : > { %p2859_p13 = pnand %p2858_p8, %p2857_p12  ;;  %p2865_p5 = scmp.lt.u32.totalorder %s2856_s15, %s3210_s12 }
  0x92   : > { %p2864_p2 = por %p2863_p3, %p2862_p1 }
  0x93   : > { %p2860_p0 = pneg %p2859_p13 }
  0x94   : > { %p2866_p9 = por %p2865_p5, %p2864_p2 }
  0x96   : > { %p2867_p4 = pnand %p2866_p9, %p2860_p0 }
  0x98   : > { %2870 = shalt.err (!%p2867_p4)
}
  0x99   : > { %s2871_s19 = scalar_lea.vmem %s3216_s29, 1024  ;;  %s2975_s11 = smov [#allocation2]  }
  0x9a   : > { %p2872_p12 = scmp.ne.s32.totalorder %s3216_s29, %s2871_s19  ;;  %s2876_s13 = sshll.u32 %s2975_s11, 4  ;;  %s2877_s13 = int_to_ptr.vmem [resolvable:$false] %s2876_s13 }
  0x9b   : > { %s2878_s9 = scalar_lea.vmem %s2877_s13, 2048  ;;  %p2879_p6 = scmp.lt.s32.totalorder %s3216_s29, %s2877_s13 }
  0x9c   : > { %p2874_p13 = pnand %p2872_p12, %p2858_p8  ;;  %p2880_p1 = scmp.lt.s32.totalorder %s2878_s9, %s2871_s19 }
  0x9e   : > { %p2875_p10 = pneg %p2874_p13  ;;  %p2881_p3 = por %p2880_p1, %p2879_p6 }
  0xa0   : > { %p2882_p2 = pnand %p2881_p3, %p2875_p10 }
  0xa2   : > { %2885 = shalt.err (!%p2882_p2)
}
  0xa3   : > { %s3571_s15 = smov 8   ;;  %s3572_s16 = smov 128  }
  0xa4   : > { %2614 = dma.hbm_to_vmem [thread:$0]  (!%p3212_p11), %s3210_s12, 1024, %s3216_s29, %s3218_s30, %s3572_s16, %s3572_s16, %s3571_s15  }
  0xa5   : > { %p3573_p8 = scmp.ne.s32.totalorder %s3563_s28, 0 }
  0xa6   : > { %s3252_s18 = sand.u32 (!%p3573_p8), 1, %s2956_s22  }
  0xa7   : > { %282 = sbr.rel (%p3573_p8) target bundleno = 1827 (0x723), region = 44  ;;  %s2274_s25 = sshll.u32 (!%p3573_p8), %s3252_s18, 6 }
  0xa8   : > { %s285_s8 = scalar_lea.sflag (!%p3573_p8), [#allocation3], %s3252_s18  ;;  %s3256_s19 = scalar_lea.vmem (!%p3573_p8), [#allocation2], %s2274_s25 }
  0xae   : > { %2931 = dma.done.wait (%p3192_p7), %s285_s8, 1024  }
  0xaf   : > { %2933 = vsyncadd (%p3192_p7), %s285_s8, 4294966272  ;;  %p3574_p6 = scmp.eq.s32.totalorder %s3035_s27, 0 }
  0xb1   : > { %2935 = dma.done.wait (%p3574_p6), [#allocation6], 1280   ;;  %p3575_p10 = pmov %p3574_p6 }
  0xb2   : > { %p3576_p11 = pmov %p3574_p6 }
  0xb3   : > { %2937 = vsyncadd (%p3575_p10), [#allocation6], 4294966016 }
  0xb4   : > { %2939 = dma.done.wait (%p3576_p11), [#allocation9], 32   ;;  %p3577_p0 = pmov %p3574_p6 }
  0xb6   : > { %2941 = vsyncadd (%p3577_p0), [#allocation9], 4294967264  ;;  %p3578_p5 = pmov %p3577_p0 }
  0xb7   : > { %p3579_p9 = pmov %p3577_p0 }
  0xb8   : > { %2943 = dma.done.wait (%p3578_p5), [#allocation12], 16  }
  0xb9   : > { %2945 = vsyncadd (%p3579_p9), [#allocation12], 4294967280  ;;  %vm379_vm0 = vcmask 64512   ;;  %v3275_v0 = vld [vmem:[%s3256_s19] sm:$0xff]  ;;  %v2281_v1 = vld [vmem:[#allocation8] ss:$0 sm:$0xff] }
  0xba   : > { %v3277_v2 = vld [vmem:[#allocation5] sm:$0xff]  ;;  %v371_v3 = vsub.f32 %v3275_v0, %v2281_v1  ;;  %v3283_v4 = vld [vmem:[%s3256_s19 + $0x8] sm:$0xff]  ;;  %v3286_v5 = vld [vmem:[%s3256_s19 + $0x10] sm:$0xff]  ;;  %vm1030_vm1 = vcmask 261120   ;;  %vm1906_vm2 = vcmask 1041409   ;;  %vm1909_vm3 = vcmask 1042434  }
  0xbb   : > { %2417 = vmatprep.mubr.msk.f32.mxu1 %vm379_vm0, %v3277_v2  ;;  %v3288_v6 = vld [vmem:[#allocation5 + $0x8] sm:$0x1]  ;;  %v372_v7 = vsub.f32 %v3283_v4, %v2281_v1  ;;  %v373_v8 = vsub.f32 %v3286_v5, %v2281_v1  ;;  %v3293_v9 = vld [vmem:[%s3256_s19 + $0x18] sm:$0xff]  ;;  %v2674_v10 = vld [vmem:[#allocation7] sm:$0xff]   ;;  %vm1912_vm4 = vcmask 1043459   ;;  %vm1915_vm5 = vcmask 1044484  }
  0xbc   : > { %2415 = vmatprep.subr.mxu1 %v371_v3  ;;  %v2675_v11 = vld [vmem:[#allocation7 + $0x8] sm:$0xff]   ;;  %v3300_v12 = vsel %vm1030_vm1, %v2674_v10, 0  ;;  %v374_v13 = vsub.f32 %v3293_v9, %v2281_v1  ;;  %2563 = vmatprep.subr.msk.bf16.mxu0 %vm1030_vm1, %v2674_v10  ;;  %v3305_v14 = vld [vmem:[%s3256_s19 + $0x20] sm:$0xff]  ;;  %v3315_v16 = vld [vmem:[%s3256_s19 + $0x28] sm:$0xff]  ;;  %vm1918_vm6 = vcmask 1045509   ;;  %vm1921_vm7 = vcmask 1046534  }
  0xbd   : > { %2416 = vmatpush3.msra.mxu1 %v371_v3  ;;  %2456 = vmatpush3.bf16.xpose.msra.mxu0 %v3300_v12  ;;  %v375_v15 = vsub.f32 %v3305_v14, %v2281_v1  ;;  %v3320_v17 = vsel %vm1030_vm1, %v2675_v11, 0  ;;  %v2676_v18 = vld [vmem:[#allocation7 + $0x10] sm:$0xff]   ;;  %v376_v19 = vsub.f32 %v3315_v16, %v2281_v1  ;;  %v3326_v20 = vld [vmem:[%s3256_s19 + $0x30] sm:$0xff]  ;;  %v3336_v22 = vld [vmem:[%s3256_s19 + $0x38] sm:$0xff]  ;;  %vm1924_vm8 = vcmask 1047559   ;;  %s2280_s28 = sshll.u32 %s3252_s18, 3 }
  0xbe   : > { %2418 = vmatmul.mubr.msk.f32.vlgmr.msra.gmra.mrb[0].mxu1 %vm379_vm0, %v3288_v6  ;;  %2420 = vmatprep.subr.mxu1 %v372_v7  ;;  %v377_v21 = vsub.f32 %v3326_v20, %v2281_v1  ;;  %v3341_v23 = vsel %vm1030_vm1, %v2676_v18, 0  ;;  %v2677_v24 = vld [vmem:[#allocation7 + $0x18] sm:$0xff]   ;;  %v378_v25 = vsub.f32 %v3336_v22, %v2281_v1  ;;  %v2678_v27 = vld [vmem:[#allocation7 + $0x20] sm:$0xff]   ;;  %v2679_v29 = vld [vmem:[#allocation7 + $0x28] sm:$0xff]   ;;  %vm2977_vm9 = vmmov 0   ;;  %s336_s17 = scalar_lea.vmem [#allocation13], %s2280_s28 }
  0xbf   : > { %2421 = vmatpush3.msra.mxu1 %v372_v7  ;;  %2422 = vmatprep.mubr.msk.f32.mxu1 %vm379_vm0, %v3277_v2  ;;  %v3355_v26 = vsel %vm1030_vm1, %v2677_v24, 0  ;;  %v3364_v28 = vsel %vm1030_vm1, %v2678_v27, 0  ;;  %v3369_v30 = vsel %vm1030_vm1, %v2679_v29, 0  ;;  %v2680_v31 = vld [vmem:[#allocation7 + $0x30] sm:$0xff]   ;;  %v2681_v33 = vld [vmem:[#allocation7 + $0x38] sm:$0xff]   ;;  %s2144_s12 = sshll.u32 %s336_s17, 4  ;;  %s3504_s12 = int_to_ptr.vmem [resolvable:$true] %s2144_s12 }
  0xc0   : > { %2425 = vmatprep.subr.mxu1 %v373_v8  ;;  %2564 = vmatprep.subr.msk.bf16.mxu0 %vm1030_vm1, %v2675_v11  ;;  %v3374_v32 = vsel %vm1030_vm1, %v2680_v31, 0  ;;  %v3379_v34 = vsel %vm1030_vm1, %v2681_v33, 0  ;;  %s2330_s29 = sshll.u32 %s3035_s27, 7  ;;  %s2131_s13 = scalar_lea.sflag [#allocation4], %s3252_s18 }
  0xc1   : > { %s3509_s11 = scalar_lea.hbm %s3557_s6, %s2330_s29  ;;  %s2886_s9 = scalar_lea.vmem %s3504_s12, 128 }
  0xc2   : > { %2423 = vmatmul.mubr.msk.f32.vlgmr.msra.gmra.mrb[2].mxu1 %vm379_vm0, %v3288_v6  ;;  %p2887_p7 = scmp.ne.s32.totalorder %s3504_s12, %s2886_s9  ;;  %p3580_p4 = scmp.ne.s32.totalorder %s3568_s10, 0 }
  0xc3   : > { %2426 = vmatpush3.msra.mxu1 %v373_v8  ;;  %2427 = vmatprep.mubr.msk.f32.mxu1 %vm379_vm0, %v3277_v2  ;;  %s2978_s27 = smov [#allocation13]  }
  0xc4   : > { %2430 = vmatprep.subr.mxu1 %v374_v13  ;;  %p2888_p12 = pnand %p2887_p7, %p3580_p4  ;;  %s2890_s15 = sshll.u32 %s2978_s27, 4  ;;  %s2891_s15 = int_to_ptr.vmem [resolvable:$false] %s2890_s15 }
  0xc5   : > { %2458 = vmatpush3.bf16.xpose.msra.mxu0 %v3320_v17  ;;  %s2892_s16 = scalar_lea.vmem %s2891_s15, 256  ;;  %p2893_p1 = scmp.lt.s32.totalorder %s3504_s12, %s2891_s15 }
  0xc6   : > { %2428 = vmatmul.mubr.msk.f32.vlgmr.msra.gmra.mrb[4].mxu1 %vm379_vm0, %v3288_v6  ;;  %2565 = vmatprep.subr.msk.bf16.mxu0 %vm1030_vm1, %v2676_v18  ;;  %p2889_p13 = pneg %p2888_p12  ;;  %p2894_p3 = scmp.lt.s32.totalorder %s2892_s16, %s2886_s9 }
  0xc7   : > { %2431 = vmatpush3.msra.mxu1 %v374_v13  ;;  %2432 = vmatprep.mubr.msk.f32.mxu1 %vm379_vm0, %v3277_v2 }
  0xc8   : > { %2435 = vmatprep.subr.mxu1 %v375_v15  ;;  %p2895_p2 = por %p2894_p3, %p2893_p1 }
  0xca   : > { %2433 = vmatmul.mubr.msk.f32.vlgmr.msra.gmra.mrb[6].mxu1 %vm379_vm0, %v3288_v6  ;;  %p2896_p8 = pnand %p2895_p2, %p2889_p13 }
  0xcb   : > { %2436 = vmatpush3.msra.mxu1 %v375_v15  ;;  %2437 = vmatprep.mubr.msk.f32.mxu1 %vm379_vm0, %v3277_v2 }
  0xcc   : > { %2440 = vmatprep.subr.mxu1 %v376_v19 }
  0xcd   : > { %2460 = vmatpush3.bf16.xpose.msra.mxu0 %v3341_v23 }
  0xce   : > { %2438 = vmatmul.mubr.msk.f32.vlgmr.msra.gmra.mrb[8].mxu1 %vm379_vm0, %v3288_v6  ;;  %2566 = vmatprep.subr.msk.bf16.mxu0 %vm1030_vm1, %v2677_v24 }
  0xcf   : > { %2441 = vmatpush3.msra.mxu1 %v376_v19  ;;  %2442 = vmatprep.mubr.msk.f32.mxu1 %vm379_vm0, %v3277_v2 }
  0xd0   : > { %2445 = vmatprep.subr.mxu1 %v377_v21 }
  0xd2   : > { %2443 = vmatmul.mubr.msk.f32.vlgmr.msra.gmra.mrb[10].mxu1 %vm379_vm0, %v3288_v6 }
  0xd3   : > { %2446 = vmatpush3.msra.mxu1 %v377_v21  ;;  %2447 = vmatprep.mubr.msk.f32.mxu1 %vm379_vm0, %v3277_v2 }
  0xd4   : > { %2450 = vmatprep.subr.mxu1 %v378_v25 }
  0xd5   : > { %2462 = vmatpush3.bf16.xpose.msra.mxu0 %v3355_v26 }
  0xd6   : > { %2448 = vmatmul.mubr.msk.f32.vlgmr.msra.gmra.mrb[12].mxu1 %vm379_vm0, %v3288_v6  ;;  %2567 = vmatprep.subr.msk.bf16.mxu0 %vm1030_vm1, %v2678_v27 }
  0xd7   : > { %2451 = vmatpush3.msra.mxu1 %v378_v25  ;;  %2452 = vmatprep.mubr.msk.f32.mxu1 %vm379_vm0, %v3277_v2 }
  0xd8   : > { %2479 = vmatprep.subr.bf16.mxu1 %v2674_v10 }
  0xda   : > { %2453 = vmatmul.mubr.msk.f32.vlgmr.msra.gmra.mrb[14].mxu1 %vm379_vm0, %v3288_v6 }
  0xdb   : > { %2480 = vmatpush3.bf16.msra.mxu1 %v2674_v10 }
  0xdc   : > { %2481 = vmatprep.subr.bf16.mxu1 %v2675_v11 }
  0xdd   : > { %2464 = vmatpush3.bf16.xpose.msra.mxu0 %v3364_v28 }
  0xde   : > { %2568 = vmatprep.subr.msk.bf16.mxu0 %vm1030_vm1, %v2679_v29 }
  0xdf   : > { %2482 = vmatpush3.bf16.msra.mxu1 %v2675_v11 }
  0xe0   : > { %2483 = vmatprep.subr.bf16.mxu1 %v2676_v18 }
  0xe3   : > { %2484 = vmatpush3.bf16.msra.mxu1 %v2676_v18 }
  0xe4   : > { %2485 = vmatprep.subr.bf16.mxu1 %v2677_v24 }
  0xe5   : > { %2466 = vmatpush3.bf16.xpose.msra.mxu0 %v3369_v30 }
  0xe6   : > { %2569 = vmatprep.subr.msk.bf16.mxu0 %vm1030_vm1, %v2680_v31 }
  0xe7   : > { %2486 = vmatpush3.bf16.msra.mxu1 %v2677_v24 }
  0xe8   : > { %2487 = vmatprep.subr.bf16.mxu1 %v2678_v27 }
  0xeb   : > { %2488 = vmatpush3.bf16.msra.mxu1 %v2678_v27 }
  0xec   : > { %2489 = vmatprep.subr.bf16.mxu1 %v2679_v29 }
  0xed   : > { %2468 = vmatpush3.bf16.xpose.msra.mxu0 %v3374_v32 }
  0xee   : > { %2570 = vmatprep.subr.msk.bf16.mxu0 %vm1030_vm1, %v2681_v33 }
  0xef   : > { %2490 = vmatpush3.bf16.msra.mxu1 %v2679_v29 }
  0xf0   : > { %2491 = vmatprep.subr.bf16.mxu1 %v2680_v31 }
  0xf3   : > { %2492 = vmatpush3.bf16.msra.mxu1 %v2680_v31 }
  0xf4   : > { %2493 = vmatprep.subr.bf16.mxu1 %v2681_v33 }
  0xf5   : > { %2470 = vmatpush3.bf16.xpose.msra.mxu0 %v3379_v34 }
  0xf7   : > { %2494 = vmatpush3.bf16.msra.mxu1 %v2681_v33 }
 0x191   : > { %v3382_v35 = vpop.f32.mrb[0].mxu1 }
 0x192   : > { %v452_v36 = vpop.f32.mrb[1].mxu1 }
 0x195   : > { %v3384_v37 = vpop.f32.mrb[2].mxu1 }
 0x196   : > { %v527_v38 = vpop.f32.mrb[3].mxu1 }
 0x197   : > { %v986_v39 = vpack.c.bf16 %v527_v38, %v452_v36 }
 0x199   : > { %v3386_v40 = vpop.f32.mrb[4].mxu1  ;;  %2471 = vmatprep.mubr.msk.bf16.mxu0 %vm1030_vm1, %v986_v39 }
 0x19a   : > { %v602_v41 = vpop.f32.mrb[5].mxu1 }
 0x19d   : > { %v3389_v42 = vpop.f32.mrb[6].mxu1 }
 0x19e   : > { %v677_v43 = vpop.f32.mrb[7].mxu1 }
 0x19f   : > { %v987_v44 = vpack.c.bf16 %v677_v43, %v602_v41 }
 0x1a1   : > { %2472 = vmatmul.mubr.msk.bf16.vlgmr.msra.gmra.mrb[0].mxu0 %vm1030_vm1, %v987_v44  ;;  %v3392_v45 = vpop.f32.mrb[8].mxu1 }
 0x1a2   : > { %v752_v46 = vpop.f32.mrb[9].mxu1 }
 0x1a5   : > { %v3394_v47 = vpop.f32.mrb[10].mxu1 }
 0x1a6   : > { %v827_v48 = vpop.f32.mrb[11].mxu1 }
 0x1a7   : > { %v988_v49 = vpack.c.bf16 %v827_v48, %v752_v46 }
 0x1a9   : > { %v3396_v50 = vpop.f32.mrb[12].mxu1  ;;  %2475 = vmatprep.mubr.msk.bf16.mxu0 %vm1030_vm1, %v988_v49 }
 0x1aa   : > { %v902_v51 = vpop.f32.mrb[13].mxu1 }
 0x1ad   : > { %v3399_v52 = vpop.f32.mrb[14].mxu1 }
 0x1ae   : > { %v977_v53 = vpop.f32.mrb[15].mxu1 }
 0x1af   : > { %v989_v54 = vpack.c.bf16 %v977_v53, %v902_v51 }
 0x1b1   : > { %2476 = vmatmul.mubr.msk.bf16.gmra.mrb[4].mxu0 %vm1030_vm1, %v989_v54 }
 0x274   : > { %v2473_v55 = vpop.f32.mrb[0].mxu0 }
 0x275   : > { %1136 = vmax.xlane.f32.xlu1 %v2473_v55  ;;  %v1101_v56 = vpop.f32.mrb[1].mxu0 }
 0x276   : > { %1132 = vmax.xlane.f32.xlu0 %v1101_v56  ;;  %v2474_v57 = vpop.f32.mrb[2].mxu0 }
 0x277   : > { %v1104_v58 = vpop.f32.mrb[3].mxu0 }
 0x279   : > { %1138 = vmax.xlane.f32.xlu1 %v2474_v57 }
 0x27a   : > { %1134 = vmax.xlane.f32.xlu0 %v1104_v58 }
 0x284   : > { %v2477_v59 = vpop.f32.mrb[4].mxu0 }
 0x285   : > { %v1117_v60 = vpop.f32.mrb[5].mxu0 }
 0x286   : > { %1140 = vmax.xlane.f32.xlu0 %v1117_v60  ;;  %v2478_v61 = vpop.f32.mrb[6].mxu0 }
 0x287   : > { %v1120_v62 = vpop.f32.mrb[7].mxu0 }
 0x288   : > { %1142 = vmax.xlane.f32.xlu1 %v1120_v62 }
 0x28a   : > { %1144 = vmax.xlane.f32.xlu0 %v2477_v59 }
 0x28c   : > { %1146 = vmax.xlane.f32.xlu1 %v2478_v61 }
 0x302   : > { %v1137_v63 = vpop.xlane.xlu1 %1136 }
 0x303   : > { %v1150_v1 = vsub.f32 %v2473_v55, %v1137_v63  ;;  %v1133_v3 = vpop.xlane.xlu0 %1132 }
 0x304   : > { %v1148_v7 = vsub.f32 %v1101_v56, %v1133_v3 }
 0x305   : > { %v1160_v8 = vmul.f32 1.442695, %v1150_v1 }
 0x306   : > { %v1156_v10 = vmul.f32 1.442695, %v1148_v7  ;;  %v1139_v11 = vpop.xlane.xlu1 %1138 }
 0x307   : > { %v1151_v13 = vsub.f32 %v2474_v57, %v1139_v11  ;;  %v1135_v15 = vpop.xlane.xlu0 %1134 }
 0x308   : > { %2682 = vpow2.f32 %v1156_v10  ;;  %v1149_v18 = vsub.f32 %v1104_v58, %v1135_v15 }
 0x309   : > { %v1162_v19 = vmul.f32 1.442695, %v1151_v13  ;;  %2684 = vpow2.f32 %v1160_v8 }
 0x30a   : > { %v1158_v21 = vmul.f32 1.442695, %v1149_v18 }
 0x30b   : > { %2686 = vpow2.f32 %v1162_v19 }
 0x30c   : > { %2688 = vpow2.f32 %v1158_v21 }
 0x312   : > { %v2683_v24 = vpop.eup %2682 }
 0x313   : > { %1172 = vadd.xlane.f32.xlu0 %v2683_v24  ;;  %v1141_v25 = vpop.xlane.xlu0 %1140  ;;  %v2685_v27 = vpop.eup %2684 }
 0x314   : > { %v1152_v29 = vsub.f32 %v1117_v60, %v1141_v25 }
 0x315   : > { %v2687_v31 = vpop.eup %2686  ;;  %v1143_v33 = vpop.xlane.xlu1 %1142 }
 0x316   : > { %v2689_v36 = vpop.eup %2688  ;;  %v1164_v38 = vmul.f32 1.442695, %v1152_v29  ;;  %v1153_v39 = vsub.f32 %v1120_v62, %v1143_v33  ;;  %v1189_v41 = vpack.c.bf16 %v2687_v31, %v2685_v27 }
 0x317   : > { %1176 = vadd.xlane.f32.xlu0 %v2685_v27  ;;  %v1145_v43 = vpop.xlane.xlu0 %1144  ;;  %1174 = vadd.xlane.f32.xlu1 %v2689_v36  ;;  %v1188_v44 = vpack.c.bf16 %v2689_v36, %v2683_v24 }
 0x318   : > { %2690 = vpow2.f32 %v1164_v38  ;;  %v1166_v46 = vmul.f32 1.442695, %v1153_v39  ;;  %v1154_v48 = vsub.f32 %v2477_v59, %v1145_v43 }
 0x319   : > { %2495 = vmatprep.mubr.bf16.mxu1 %v1188_v44  ;;  %v1147_v49 = vpop.xlane.xlu1 %1146 }
 0x31a   : > { %2692 = vpow2.f32 %v1166_v46  ;;  %v1168_v51 = vmul.f32 1.442695, %v1154_v48  ;;  %v1155_v53 = vsub.f32 %v2478_v61, %v1147_v49  ;;  %2496 = vmatmul.mubr.bf16.vlgmr.msra.gmra.mrb[16].mxu1 %v1189_v41 }
 0x31b   : > { %1178 = vadd.xlane.f32.xlu1 %v2687_v31 }
 0x31c   : > { %2694 = vpow2.f32 %v1168_v51  ;;  %v1170_v54 = vmul.f32 1.442695, %v1155_v53 }
 0x31e   : > { %2696 = vpow2.f32 %v1170_v54 }
 0x322   : > { %v2691_v55 = vpop.eup %2690 }
 0x323   : > { %1180 = vadd.xlane.f32.xlu0 %v2691_v55 }
 0x324   : > { %v2693_v56 = vpop.eup %2692 }
 0x325   : > { %1182 = vadd.xlane.f32.xlu1 %v2693_v56  ;;  %v1190_v57 = vpack.c.bf16 %v2693_v56, %v2691_v55 }
 0x326   : > { %v2695_v58 = vpop.eup %2694 }
 0x327   : > { %1184 = vadd.xlane.f32.xlu0 %v2695_v58  ;;  %2499 = vmatprep.mubr.bf16.mxu1 %v1190_v57 }
 0x328   : > { %v2697_v60 = vpop.eup %2696 }
 0x329   : > { %1186 = vadd.xlane.f32.xlu1 %v2697_v60  ;;  %v1191_v59 = vpack.c.bf16 %v2697_v60, %v2695_v58 }
 0x32b   : > { %2500 = vmatmul.mubr.bf16.gmra.mrb[20].mxu1 %v1191_v59 }
 0x32c   : > { %2505 = vmatprep.mubr.msk.f32.mxu1 %vm379_vm0, %v3277_v2 }
 0x3a0   : > { %v1173_v61 = vpop.xlane.xlu0 %1172 }
 0x3a1   : > { %v1265_v1 = vadd.f32 1e-08, %v1173_v61 }
 0x3a3   : > { %2698 = vrcp.f32 %v1265_v1 }
 0x3a4   : > { %v1175_v62 = vpop.xlane.xlu1 %1174  ;;  %v1177_v63 = vpop.xlane.xlu0 %1176 }
 0x3a5   : > { %v1267_v3 = vadd.f32 1e-08, %v1177_v63  ;;  %v1266_v7 = vadd.f32 1e-08, %v1175_v62 }
 0x3a7   : > { %2700 = vrcp.f32 %v1267_v3 }
 0x3a8   : > { %v1179_v8 = vpop.xlane.xlu1 %1178  ;;  %2702 = vrcp.f32 %v1266_v7 }
 0x3a9   : > { %v1268_v10 = vadd.f32 1e-08, %v1179_v8 }
 0x3ab   : > { %2704 = vrcp.f32 %v1268_v10 }
 0x3ad   : > { %v2699_v15 = vpop.eup %2698 }
 0x3b0   : > { %v1181_v11 = vpop.xlane.xlu0 %1180 }
 0x3b1   : > { %v2701_v21 = vpop.eup %2700  ;;  %v1269_v33 = vadd.f32 1e-08, %v1181_v11 }
 0x3b2   : > { %v1183_v18 = vpop.xlane.xlu1 %1182  ;;  %v2703_v27 = vpop.eup %2702 }
 0x3b3   : > { %v1270_v41 = vadd.f32 1e-08, %v1183_v18  ;;  %2706 = vrcp.f32 %v1269_v33 }
 0x3b4   : > { %v1185_v29 = vpop.xlane.xlu0 %1184 }
 0x3b5   : > { %v1271_v43 = vadd.f32 1e-08, %v1185_v29  ;;  %v2705_v46 = vpop.eup %2704  ;;  %2708 = vrcp.f32 %v1270_v41 }
 0x3b6   : > { %v1187_v48 = vpop.xlane.xlu1 %1186 }
 0x3b7   : > { %2710 = vrcp.f32 %v1271_v43 }
 0x3bd   : > { %v2707_v53 = vpop.eup %2706 }
 0x3ed   : > { %v2497_v13 = vpop.f32.mrb[16].mxu1 }
 0x3ee   : > { %v1234_v19 = vpop.f32.mrb[17].mxu1  ;;  %v1278_v36 = vmul.f32 %v2701_v21, %v2497_v13 }
 0x3ef   : > { %v1274_v24 = vmul.f32 %v2699_v15, %v1234_v19  ;;  %v2498_v25 = vpop.f32.mrb[18].mxu1 }
 0x3f0   : > { %v1237_v31 = vpop.f32.mrb[19].mxu1  ;;  %v1291_v49 = vsub.f32 %v3286_v5, %v1278_v36  ;;  %v1280_v51 = vmul.f32 %v2705_v46, %v2498_v25 }
 0x3f1   : > { %v1289_v38 = vsub.f32 %v3275_v0, %v1274_v24  ;;  %v1276_v39 = vmul.f32 %v2703_v27, %v1237_v31  ;;  %v1272_v0 = vadd.f32 1e-08, %v1187_v48 }
 0x3f3   : > { %v1290_v44 = vsub.f32 %v3283_v4, %v1276_v39  ;;  %2503 = vmatprep.subr.mxu1 %v1289_v38  ;;  %v1292_v4 = vsub.f32 %v3293_v9, %v1280_v51  ;;  %2712 = vrcp.f32 %v1272_v0  ;;  %v2709_v9 = vpop.eup %2708 }
 0x3f4   : > { %2504 = vmatpush3.msra.mxu1 %v1289_v38  ;;  %v2711_v57 = vpop.eup %2710 }
 0x3f5   : > { %2506 = vmatmul.mubr.msk.f32.vlgmr.msra.gmra.mrb[24].mxu1 %vm379_vm0, %v3288_v6  ;;  %2508 = vmatprep.subr.mxu1 %v1290_v44 }
 0x3f6   : > { %2509 = vmatpush3.msra.mxu1 %v1290_v44  ;;  %2510 = vmatprep.mubr.msk.f32.mxu1 %vm379_vm0, %v3277_v2 }
 0x3f7   : > { %2513 = vmatprep.subr.mxu1 %v1291_v49 }
 0x3f9   : > { %2511 = vmatmul.mubr.msk.f32.vlgmr.msra.gmra.mrb[26].mxu1 %vm379_vm0, %v3288_v6 }
 0x3fa   : > { %2514 = vmatpush3.msra.mxu1 %v1291_v49  ;;  %2515 = vmatprep.mubr.msk.f32.mxu1 %vm379_vm0, %v3277_v2 }
 0x3fb   : > { %2518 = vmatprep.subr.mxu1 %v1292_v4 }
 0x3fd   : > { %2516 = vmatmul.mubr.msk.f32.vlgmr.msra.gmra.mrb[28].mxu1 %vm379_vm0, %v3288_v6  ;;  %v2713_v63 = vpop.eup %2712 }
 0x3fe   : > { %2519 = vmatpush3.msra.mxu1 %v1292_v4  ;;  %v2501_v5 = vpop.f32.mrb[20].mxu1  ;;  %2520 = vmatprep.mubr.msk.f32.mxu1 %vm379_vm0, %v3277_v2 }
 0x3ff   : > { %v1250_v54 = vpop.f32.mrb[21].mxu1  ;;  %v1286_v60 = vmul.f32 %v2711_v57, %v2501_v5  ;;  %v2976_v5 = vmov 0.0  }
 0x400   : > { %v1282_v55 = vmul.f32 %v2707_v53, %v1250_v54  ;;  %v2502_v56 = vpop.f32.mrb[22].mxu1  ;;  %2543 = vmatprep.subr.bf16.mxu0 %v2976_v5  ;;  %2559 = vmatprep.mubr.msk.bf16.mxu0 %vm2977_vm9, %v2976_v5 }
 0x401   : > { %v1253_v58 = vpop.f32.mrb[23].mxu1  ;;  %2521 = vmatmul.mubr.msk.f32.vlgmr.msra.gmra.mrb[30].mxu1 %vm379_vm0, %v3288_v6  ;;  %v1295_v1 = vsub.f32 %v3326_v20, %v1286_v60  ;;  %v1288_v3 = vmul.f32 %v2713_v63, %v2502_v56  ;;  %2544 = vmatpush3.bf16.xpose.msra.mxu0 %v3300_v12 }
 0x402   : > { %v1293_v59 = vsub.f32 %v3305_v14, %v1282_v55  ;;  %v1284_v61 = vmul.f32 %v2709_v9, %v1253_v58  ;;  %2525 = vmatprep.mubr.msk.f32.mxu1 %vm379_vm0, %v3277_v2  ;;  %2545 = vmatprep.subr.bf16.mxu0 %v2976_v5 }
 0x403   : > { %v1296_v14 = vsub.f32 %v3336_v22, %v1288_v3 }
 0x404   : > { %v1294_v62 = vsub.f32 %v3315_v16, %v1284_v61  ;;  %2523 = vmatprep.subr.mxu1 %v1293_v59 }
 0x405   : > { %2524 = vmatpush3.msra.mxu1 %v1293_v59 }
 0x406   : > { %2526 = vmatmul.mubr.msk.f32.vlgmr.msra.gmra.mrb[32].mxu1 %vm379_vm0, %v3288_v6  ;;  %2528 = vmatprep.subr.mxu1 %v1294_v62 }
 0x407   : > { %2529 = vmatpush3.msra.mxu1 %v1294_v62  ;;  %2530 = vmatprep.mubr.msk.f32.mxu1 %vm379_vm0, %v3277_v2 }
 0x408   : > { %2533 = vmatprep.subr.mxu1 %v1295_v1 }
 0x409   : > { %2546 = vmatpush3.bf16.xpose.msra.mxu0 %v3320_v17 }
 0x40a   : > { %2531 = vmatmul.mubr.msk.f32.vlgmr.msra.gmra.mrb[34].mxu1 %vm379_vm0, %v3288_v6  ;;  %2547 = vmatprep.subr.bf16.mxu0 %v2976_v5 }
 0x40b   : > { %2534 = vmatpush3.msra.mxu1 %v1295_v1  ;;  %2535 = vmatprep.mubr.msk.f32.mxu1 %vm379_vm0, %v3277_v2 }
 0x40c   : > { %2538 = vmatprep.subr.mxu1 %v1296_v14 }
 0x40e   : > { %2536 = vmatmul.mubr.msk.f32.vlgmr.msra.gmra.mrb[36].mxu1 %vm379_vm0, %v3288_v6 }
 0x40f   : > { %2539 = vmatpush3.msra.mxu1 %v1296_v14  ;;  %2540 = vmatprep.mubr.msk.f32.mxu1 %vm379_vm0, %v3277_v2 }
 0x411   : > { %2548 = vmatpush3.bf16.xpose.msra.mxu0 %v3341_v23 }
 0x412   : > { %2541 = vmatmul.mubr.msk.f32.vlgmr.msra.gmra.mrb[38].mxu1 %vm379_vm0, %v3288_v6  ;;  %2549 = vmatprep.subr.bf16.mxu0 %v2976_v5 }
 0x419   : > { %2550 = vmatpush3.bf16.xpose.msra.mxu0 %v3355_v26 }
 0x41a   : > { %2551 = vmatprep.subr.bf16.mxu0 %v2976_v5 }
 0x421   : > { %2552 = vmatpush3.bf16.xpose.msra.mxu0 %v3364_v28 }
 0x422   : > { %2553 = vmatprep.subr.bf16.mxu0 %v2976_v5 }
 0x429   : > { %2554 = vmatpush3.bf16.xpose.msra.mxu0 %v3369_v30 }
 0x42a   : > { %2555 = vmatprep.subr.bf16.mxu0 %v2976_v5 }
 0x431   : > { %2556 = vmatpush3.bf16.xpose.msra.mxu0 %v3374_v32 }
 0x432   : > { %2557 = vmatprep.subr.bf16.mxu0 %v2976_v5 }
 0x439   : > { %2558 = vmatpush3.bf16.xpose.msra.mxu0 %v3379_v34 }
 0x4c8   : > { %v2507_v16 = vpop.f32.mrb[24].mxu1 }
 0x4c9   : > { %v3443_v20 = vadd.f32 %v2507_v16, %v3382_v35  ;;  %v1363_v22 = vpop.f32.mrb[25].mxu1 }
 0x4cc   : > { %v2512_v7 = vpop.f32.mrb[26].mxu1 }
 0x4cd   : > { %v3446_v8 = vadd.f32 %v2512_v7, %v3384_v37  ;;  %v1437_v10 = vpop.f32.mrb[27].mxu1 }
 0x4cf   : > { %v1905_v27 = vrot.slane %v3446_v8, 7 }
 0x4d0   : > { %v2517_v11 = vpop.f32.mrb[28].mxu1 }
 0x4d1   : > { %v3449_v13 = vadd.f32 %v2517_v11, %v3386_v40  ;;  %v1511_v15 = vpop.f32.mrb[29].mxu1  ;;  %v1907_v36 = vsel %vm1906_vm2, %v1905_v27, %v3443_v20 }
 0x4d3   : > { %v1908_v40 = vrot.slane %v3449_v13, 6 }
 0x4d4   : > { %v2522_v18 = vpop.f32.mrb[30].mxu1 }
 0x4d5   : > { %v3452_v2 = vadd.f32 %v2522_v18, %v3389_v42  ;;  %v1585_v6 = vpop.f32.mrb[31].mxu1  ;;  %v1910_v38 = vsel %vm1909_vm3, %v1908_v40, %v1907_v36 }
 0x4d7   : > { %v1911_v42 = vrot.slane %v3452_v2, 5 }
 0x4d9   : > { %v2527_v19 = vpop.f32.mrb[32].mxu1  ;;  %v1913_v43 = vsel %vm1912_vm4, %v1911_v42, %v1910_v38 }
 0x4da   : > { %v3455_v35 = vadd.f32 %v2527_v19, %v3392_v45  ;;  %v1659_v21 = vpop.f32.mrb[33].mxu1 }
 0x4dc   : > { %v1914_v45 = vrot.slane %v3455_v35, 4 }
 0x4dd   : > { %v2532_v24 = vpop.f32.mrb[34].mxu1 }
 0x4de   : > { %v1894_v37 = vadd.f32 %v2532_v24, %v3394_v47  ;;  %v1733_v25 = vpop.f32.mrb[35].mxu1  ;;  %v1916_v46 = vsel %vm1915_vm5, %v1914_v45, %v1913_v43  ;;  %v2326_v45 = vld [vmem:[#allocation10] ss:$0 sm:$0xff] }
 0x4e0   : > { %v1917_v47 = vrot.slane %v1894_v37, 3 }
 0x4e1   : > { %v2537_v29 = vpop.f32.mrb[36].mxu1 }
 0x4e2   : > { %v1895_v31 = vadd.f32 %v2537_v29, %v3396_v50  ;;  %v1807_v33 = vpop.f32.mrb[37].mxu1  ;;  %v1919_v49 = vsel %vm1918_vm6, %v1917_v47, %v1916_v46  ;;  %v2327_v46 = vld [vmem:[#allocation11] ss:$0 sm:$0xff] }
 0x4e4   : > { %v1920_v39 = vrot.slane %v1895_v31, 2 }
 0x4e5   : > { %v2542_v41 = vpop.f32.mrb[38].mxu1 }
 0x4e6   : > { %v1896_v44 = vadd.f32 %v2542_v41, %v3399_v52  ;;  %v1881_v50 = vpop.f32.mrb[39].mxu1  ;;  %v1922_v51 = vsel %vm1921_vm7, %v1920_v39, %v1919_v49 }
 0x4e8   : > { %v1923_v48 = vrot.slane %v1896_v44, 1 }
 0x4ea   : > { %v1925_v0 = vsel %vm1924_vm8, %v1923_v48, %v1922_v51 }
 0x4eb   : > { %v1927_v4 = vsel %vm1030_vm1, %v1925_v0, 0.0 }
 0x4ec   : > { %1928 = vadd.xlane.f32.xlu0 %v1927_v4 }
 0x579   : > { %v1929_v12 = vpop.xlane.xlu0 %1928 }
 0x57a   : > { %v1931_v17 = vmul.f32 0.03125, %v1929_v12 }
 0x57c   : > { %v1933_v52 = vrot.slane %v1931_v17, 1  ;;  %v1934_v53 = vrot.slane %v1931_v17, 2  ;;  %v1935_v23 = vrot.slane %v1931_v17, 3  ;;  %v1936_v54 = vrot.slane %v1931_v17, 4 }
 0x57d   : > { %v1937_v9 = vrot.slane %v1931_v17, 5  ;;  %v1938_v26 = vrot.slane %v1931_v17, 6  ;;  %v1939_v55 = vrot.slane %v1931_v17, 7  ;;  %v1948_v28 = vsub.f32 %v3443_v20, %v1931_v17 }
 0x57e   : > { %v1949_v56 = vsub.f32 %v3446_v8, %v1933_v52  ;;  %v1950_v30 = vsub.f32 %v3449_v13, %v1934_v53  ;;  %v1951_v32 = vsub.f32 %v3452_v2, %v1935_v23  ;;  %v1952_v57 = vsub.f32 %v3455_v35, %v1936_v54 }
 0x57f   : > { %v1953_v34 = vsub.f32 %v1894_v37, %v1937_v9  ;;  %v1954_v58 = vsub.f32 %v1895_v31, %v1938_v26  ;;  %v1955_v60 = vsub.f32 %v1896_v44, %v1939_v55  ;;  %v1956_v1 = vmul.f32 %v1948_v28, %v1948_v28 }
 0x580   : > { %v1957_v59 = vmul.f32 %v1949_v56, %v1949_v56  ;;  %v1958_v61 = vmul.f32 %v1950_v30, %v1950_v30  ;;  %v1959_v62 = vmul.f32 %v1951_v32, %v1951_v32  ;;  %v1960_v63 = vmul.f32 %v1952_v57, %v1952_v57 }
 0x581   : > { %v1961_v3 = vmul.f32 %v1953_v34, %v1953_v34  ;;  %v1962_v20 = vmul.f32 %v1954_v58, %v1954_v58  ;;  %v1963_v22 = vmul.f32 %v1955_v60, %v1955_v60 }
 0x582   : > { %v1972_v14 = vrot.slane %v1957_v59, 7  ;;  %v1974_v16 = vrot.slane %v1958_v61, 6  ;;  %v1976_v8 = vrot.slane %v1959_v62, 5  ;;  %v1978_v11 = vrot.slane %v1960_v63, 4 }
 0x583   : > { %v1980_v15 = vrot.slane %v1961_v3, 3  ;;  %v1982_v2 = vrot.slane %v1962_v20, 2  ;;  %v1984_v19 = vrot.slane %v1963_v22, 1 }
 0x584   : > { %v1973_v7 = vsel %vm1906_vm2, %v1972_v14, %v1956_v1 }
 0x585   : > { %v1975_v10 = vsel %vm1909_vm3, %v1974_v16, %v1973_v7 }
 0x586   : > { %v1977_v13 = vsel %vm1912_vm4, %v1976_v8, %v1975_v10 }
 0x587   : > { %v1979_v18 = vsel %vm1915_vm5, %v1978_v11, %v1977_v13 }
 0x588   : > { %v1981_v6 = vsel %vm1918_vm6, %v1980_v15, %v1979_v18 }
 0x589   : > { %v1983_v35 = vsel %vm1921_vm7, %v1982_v2, %v1981_v6 }
 0x58a   : > { %v1985_v21 = vsel %vm1924_vm8, %v1984_v19, %v1983_v35 }
 0x58b   : > { %v1987_v24 = vsel %vm1030_vm1, %v1985_v21, 0.0 }
 0x58c   : > { %1988 = vadd.xlane.f32.xlu1 %v1987_v24 }
 0x619   : > { %v1989_v37 = vpop.xlane.xlu1 %1988 }
 0x61a   : > { %v1990_v25 = vmul.f32 0.03125, %v1989_v37 }
 0x61c   : > { %v1991_v27 = vadd.f32 1e-05, %v1990_v25 }
 0x61e   : > { %2714 = vrsqrt.f32 %v1991_v27 }
 0x628   : > { %v2715_v40 = vpop.eup %2714 }
 0x629   : > { %v1994_v29 = vrot.slane %v2715_v40, 1  ;;  %v1995_v42 = vrot.slane %v2715_v40, 2  ;;  %v1996_v31 = vrot.slane %v2715_v40, 3  ;;  %v1997_v33 = vrot.slane %v2715_v40, 4 }
 0x62a   : > { %v1998_v36 = vrot.slane %v2715_v40, 5  ;;  %v1999_v47 = vrot.slane %v2715_v40, 6  ;;  %v2000_v38 = vrot.slane %v2715_v40, 7  ;;  %v2009_v39 = vmul.f32 %v2715_v40, %v1948_v28 }
 0x62b   : > { %v2010_v41 = vmul.f32 %v1994_v29, %v1949_v56  ;;  %v2011_v43 = vmul.f32 %v1995_v42, %v1950_v30  ;;  %v2012_v44 = vmul.f32 %v1996_v31, %v1951_v32  ;;  %v2013_v50 = vmul.f32 %v1997_v33, %v1952_v57 }
 0x62c   : > { %v2014_v48 = vmul.f32 %v1998_v36, %v1953_v34  ;;  %v2015_v49 = vmul.f32 %v1999_v47, %v1954_v58  ;;  %v2016_v51 = vmul.f32 %v2000_v38, %v1955_v60  ;;  %v2024_v0 = vmul.f32 %v2326_v45, %v2009_v39 }
 0x62d   : > { %v2025_v4 = vmul.f32 %v2326_v45, %v2010_v41  ;;  %v2026_v5 = vmul.f32 %v2326_v45, %v2011_v43  ;;  %v2027_v12 = vmul.f32 %v2326_v45, %v2012_v44  ;;  %v2028_v17 = vmul.f32 %v2326_v45, %v2013_v50 }
 0x62e   : > { %v2029_v52 = vmul.f32 %v2326_v45, %v2014_v48  ;;  %v2030_v53 = vmul.f32 %v2326_v45, %v2015_v49  ;;  %v2031_v23 = vmul.f32 %v2326_v45, %v2016_v51  ;;  %v2039_v54 = vadd.f32 %v2327_v46, %v2024_v0 }
 0x62f   : > { %v2040_v9 = vadd.f32 %v2327_v46, %v2025_v4  ;;  %v2041_v26 = vadd.f32 %v2327_v46, %v2026_v5  ;;  %v2042_v55 = vadd.f32 %v2327_v46, %v2027_v12  ;;  %v2043_v28 = vadd.f32 %v2327_v46, %v2028_v17 }
 0x630   : > { %v2044_v56 = vadd.f32 %v2327_v46, %v2029_v52  ;;  %v2045_v30 = vadd.f32 %v2327_v46, %v2030_v53  ;;  %v2046_v32 = vadd.f32 %v2327_v46, %v2031_v23  ;;  %v2047_v57 = vpack.c.bf16 %v2039_v54, %v2039_v54 }
 0x631   : > { %v2048_v34 = vpack.c.bf16 %v2040_v9, %v2040_v9  ;;  %v2049_v58 = vpack.c.bf16 %v2041_v26, %v2041_v26  ;;  %v2050_v60 = vpack.c.bf16 %v2042_v55, %v2042_v55  ;;  %v2051_v59 = vpack.c.bf16 %v2043_v28, %v2043_v28 }
 0x632   : > { %v2052_v61 = vpack.c.bf16 %v2044_v56, %v2044_v56  ;;  %v2053_v62 = vpack.c.bf16 %v2045_v30, %v2045_v30  ;;  %v2054_v63 = vpack.c.bf16 %v2046_v32, %v2046_v32  ;;  %v2063_v20 = vunpack.c.l.b16 %v2047_v57 }
 0x633   : > { %v2064_v1 = vunpack.c.l.b16 %v2048_v34  ;;  %v2065_v3 = vunpack.c.l.b16 %v2049_v58  ;;  %v2066_v14 = vunpack.c.l.b16 %v2050_v60  ;;  %v2067_v16 = vunpack.c.l.b16 %v2051_v59 }
 0x634   : > { %v2068_v22 = vunpack.c.l.b16 %v2052_v61  ;;  %v2069_v10 = vunpack.c.l.b16 %v2053_v62  ;;  %v2070_v11 = vunpack.c.l.b16 %v2054_v63 }
 0x635   : > { %v2071_v7 = vrot.slane %v2064_v1, 7  ;;  %v2073_v8 = vrot.slane %v2065_v3, 6  ;;  %v2075_v15 = vrot.slane %v2066_v14, 5  ;;  %v2077_v2 = vrot.slane %v2067_v16, 4 }
 0x636   : > { %v2079_v19 = vrot.slane %v2068_v22, 3  ;;  %v2081_v21 = vrot.slane %v2069_v10, 2  ;;  %v2083_v37 = vrot.slane %v2070_v11, 1 }
 0x637   : > { %v2072_v13 = vsel %vm1906_vm2, %v2071_v7, %v2063_v20 }
 0x638   : > { %v2074_v18 = vsel %vm1909_vm3, %v2073_v8, %v2072_v13 }
 0x639   : > { %v2076_v6 = vsel %vm1912_vm4, %v2075_v15, %v2074_v18 }
 0x63a   : > { %v2078_v35 = vsel %vm1915_vm5, %v2077_v2, %v2076_v6 }
 0x63b   : > { %v2080_v24 = vsel %vm1918_vm6, %v2079_v19, %v2078_v35 }
 0x63c   : > { %v2082_v25 = vsel %vm1921_vm7, %v2081_v21, %v2080_v24 }
 0x63d   : > { %v2084_v27 = vsel %vm1924_vm8, %v2083_v37, %v2082_v25 }
 0x63e   : > { %v2085_v40 = vpack.c.b16 %v2084_v27, %v2084_v27 }
 0x640   : > { %2560 = vmatmul.mubr.msk.bf16.vlgmr.msra.gmra.mrb[8].mxu0 %vm1030_vm1, %v2085_v40 }
 0x713   : > { %v2123_v29 = vpop.f32.mrb[8].mxu0 }
 0x714   : > { %2129 = vst [vmem:[%s336_s17] sm:$0xff] %v2123_v29  ;;  %v2561_v42 = vpop.f32.mrb[9].mxu0 }
 0x715   : > { %v2126_v31 = vpop.f32.mrb[10].mxu0 }
 0x716   : > { %2899 = shalt.err (!%p2896_p8)
}
 0x717   : > { %s2900_s18 = scalar_lea.hbm %s3509_s11, 128  ;;  %s2904_s19 = scalar_lea.hbm %s3557_s6, 256 }
 0x718   : > { %p2901_p6 = scmp.ne.s32.totalorder %s3509_s11, %s2900_s18  ;;  %p2905_p0 = scmp.lt.u32.totalorder %s3509_s11, %s3557_s6 }
 0x719   : > { %p2906_p5 = scmp.lt.u32.totalorder %s2904_s19, %s2900_s18  ;;  %p2908_p7 = scmp.lt.u32.totalorder %s2900_s18, %s3509_s11 }
 0x71a   : > { %p2902_p10 = pnand %p2901_p6, %p3580_p4 }
 0x71b   : > { %p2907_p9 = por %p2906_p5, %p2905_p0 }
 0x71c   : > { %p2903_p11 = pneg %p2902_p10 }
 0x71d   : > { %p2909_p12 = por %p2908_p7, %p2907_p9 }
 0x71f   : > { %p2910_p13 = pnand %p2909_p12, %p2903_p11 }
 0x721   : > { %2913 = shalt.err (!%p2910_p13)
}
 0x722   : > { %2593 = dma.vmem_to_hbm [thread:$0]  (%p3580_p4), %s3504_s12, 128, %s3509_s11, %s2131_s13   ;;  %v2562_v33 = vpop.f32.mrb[11].mxu0 }
 0x723 PF: > { %s2156_s29 = sand.u32 1, %s2952_s21   ;;  %p3581_p1 = scmp.ne.s32.totalorder %s3569_s20, 0 }
 0x724   : > { %p3582_p3 = scmp.ge.s32.totalorder %s2964_s24, 2  ;;  %s2157_s14 = scalar_lea.sflag [#allocation4], %s2156_s29 }
 0x726   : > { %p2616_p2 = pnand %p3582_p3, %p3581_p1 }
 0x728   : > { %2947 = dma.done.wait (!%p2616_p2), %s2157_s14, 128  }
 0x729   : > { %2949 = vsyncadd (!%p2616_p2), %s2157_s14, 4294967168  ;;  %p22_p8 = scmp.ge.s32.totalorder %s3176_s7, 4   ;;  %s3583_s21 = smov %s2956_s22 }
 0x72a   : > { %s3584_s22 = smov %s2960_s23  ;;  %s3585_s23 = smov %s3188_s26 }
 0x72b   : > { %s3586_s24 = smov %s3176_s7  ;;  %24 = sbr.rel (!%p22_p8) target bundleno = 8 (0x8), region = 109 }
 0x732   :  { %2162 = vsyncpa [#allocation3], 1 }
 0x733   :  { %2164 = vsyncpa [#allocation3 + $0x1], 1 }
 0x734   :  { %2165 = vsyncpa [#allocation6], 1 }
 0x735   :  { %2166 = vsyncpa [#allocation9], 1 }
 0x736   :  { %2167 = vsyncpa [#allocation12], 1 }
 0x737   :  { %2168 = vsyncpa [#allocation4], 1 }
 0x738   :  { %2170 = vsyncpa [#allocation4 + $0x1], 1 }

// kernel: tpu_custom_call.1
= control target key start
LH: loop header
LB: loop body
LE: loop exit
PB: predicated region body
PF: predicated region fallthrough
CT: control target
= control target key end

     0   :  { %11 = vsyncpa [#allocation3], 0  ;;  %s3551_s0 = inlined_call_operand.hbm [shape: f32[2,64,32], index: 0, kind: input, shape index: {}]   ;;  %s3552_s1 = inlined_call_operand.hbm [shape: f32[9,8], index: 1, kind: input, shape index: {}]   ;;  %s3553_s2 = inlined_call_operand.hbm [shape: bf16[128,32], index: 2, kind: input, shape index: {}]   ;;  %s3554_s3 = inlined_call_operand.hbm [shape: f32[1,32], index: 3, kind: input, shape index: {}]   ;;  %s3555_s4 = inlined_call_operand.hbm [shape: f32[1,32], index: 4, kind: input, shape index: {}]   ;;  %s3556_s5 = inlined_call_operand.hbm [shape: f32[1,32], index: 5, kind: input, shape index: {}]   ;;  %s3557_s6 = inlined_call_operand.hbm [shape: f32[16,128], index: 6, kind: output, shape index: {}]  }
   0x1   :  { %13 = vsyncpa [#allocation3 + $0x1], 0 }
   0x2   :  { %14 = vsyncpa [#allocation6], 0 }
   0x3   :  { %15 = vsyncpa [#allocation9], 0 }
   0x4   :  { %16 = vsyncpa [#allocation12], 0 }
   0x5   :  { %17 = vsyncpa [#allocation4], 0 }
   0x6   :  { %19 = vsyncpa [#allocation4 + $0x1], 0  ;;  %s3014_s21 = smov 0   ;;  %s3016_s22 = smov 0  }
   0x7   :  { %s3018_s23 = smov 0   ;;  %s3020_s24 = smov 0  }
   0x8 LB: > { %s2966_s25 = smov [#allocation5]   ;;  %s3035_s27 = sadd.s32 4294967295, %s2964_s24   ;;  %s2964_s24 = sphi %s3020_s24, %s3586_s24   ;;  %s2960_s23 = sphi %s3018_s23, %s3585_s23   ;;  %s2956_s22 = sphi %s3016_s22, %s3584_s22   ;;  %s2952_s21 = sphi %s3014_s21, %s3583_s21  }
   0x9   : > { %s199_s26 = sshll.u32 %s2966_s25, 4  ;;  %p2263_p0 = scmp.ge.s32.totalorder %s2964_s24, 1  ;;  %s3040_s26 = int_to_ptr.vmem [resolvable:$true] %s199_s26 }
   0xa   : > { %p3560_p1 = scmp.eq.s32.totalorder %s3035_s27, 0  ;;  %p187_p2 = scmp.lt.s32.totalorder %s2964_s24, 3 }
   0xb   : > { %s2967_s29 = smov [#allocation8]   ;;  %s2968_s8 = smov [#allocation7]  }
   0xc   : > { %p3042_p3 = pnand %p2263_p0, %p187_p2  ;;  %s226_s30 = sshll.u32 %s2967_s29, 4  ;;  %s3055_s30 = int_to_ptr.vmem [resolvable:$true] %s226_s30 }
   0xd   : > { %s212_s9 = sshll.u32 %s2968_s8, 4  ;;  %s2716_s12 = scalar_lea.hbm %s3552_s1, 256  ;;  %s3057_s9 = int_to_ptr.vmem [resolvable:$true] %s212_s9 }
   0xe   : > { %s3563_s28 = scalar_select %p3042_p3, 1, 0 }
   0xf   : > { %p2595_p5 = pneg %p3042_p3  ;;  %p2717_p7 = scmp.ne.s32.totalorder %s3552_s1, %s2716_s12 }
  0x10   : > { %p2723_p11 = scmp.lt.u32.totalorder %s2716_s12, %s3552_s1 }
  0x11   : > { %p3051_p6 = pnand %p2595_p5, %p3560_p1 }
  0x13   : > { %p3067_p8 = pneg %p3051_p6 }
  0x15   : > { %p2719_p9 = pnand %p3067_p8, %p2717_p7 }
  0x17   : > { %p2720_p10 = pneg %p2719_p9 }
  0x19   : > { %p2725_p12 = pnand %p2723_p11, %p2720_p10 }
  0x1b   : > { %2728 = shalt.err (!%p2725_p12)
}
  0x1c   : > { %s2729_s18 = scalar_lea.vmem %s3040_s26, 256  ;;  %p2737_p5 = scmp.lt.s32.totalorder %s3040_s26, %s3040_s26 }
  0x1d   : > { %p2730_p13 = scmp.ne.s32.totalorder %s3040_s26, %s2729_s18  ;;  %p2738_p4 = scmp.lt.s32.totalorder %s2729_s18, %s2729_s18 }
  0x1f   : > { %p2732_p0 = pnand %p2730_p13, %p3067_p8  ;;  %p2739_p7 = por %p2738_p4, %p2737_p5 }
  0x21   : > { %p2733_p2 = pneg %p2732_p0 }
  0x23   : > { %p2740_p9 = pnand %p2739_p7, %p2733_p2 }
  0x25   : > { %2743 = shalt.err (!%p2740_p9)
}
  0x26   : > { %s3558_s19 = smov 128   ;;  %s3559_s20 = smov 8  }
  0x27   : > { %2598 = dma.hbm_to_vmem [thread:$0]  (!%p3051_p6), %s3552_s1, 256, %s3040_s26, [#allocation6], %s3558_s19, %s3558_s19, %s3559_s20  }
  0x28   : > { %s2744_s11 = scalar_lea.hbm %s3554_s3, 16 }
  0x29   : > { %p2745_p4 = scmp.ne.s32.totalorder %s3554_s3, %s2744_s11  ;;  %p2751_p12 = scmp.lt.u32.totalorder %s2744_s11, %s3554_s3 }
  0x2b   : > { %p2747_p10 = pnand %p2745_p4, %p3067_p8 }
  0x2d   : > { %p2748_p11 = pneg %p2747_p10 }
  0x2f   : > { %p2753_p13 = pnand %p2751_p12, %p2748_p11 }
  0x31   : > { %2756 = shalt.err (!%p2753_p13)
}
  0x32   : > { %s2757_s26 = scalar_lea.vmem %s3055_s30, 16  ;;  %s2764_s17 = scalar_lea.vmem %s3055_s30, 32 }
  0x33   : > { %p2758_p0 = scmp.ne.s32.totalorder %s3055_s30, %s2757_s26  ;;  %p2765_p7 = scmp.lt.s32.totalorder %s3055_s30, %s3055_s30 }
  0x34   : > { %p2766_p9 = scmp.lt.s32.totalorder %s2764_s17, %s2757_s26 }
  0x35   : > { %p2760_p2 = pnand %p2758_p0, %p3067_p8 }
  0x36   : > { %p2767_p4 = por %p2766_p9, %p2765_p7 }
  0x37   : > { %p2761_p5 = pneg %p2760_p2 }
  0x39   : > { %p2768_p10 = pnand %p2767_p4, %p2761_p5 }
  0x3b   : > { %2771 = shalt.err (!%p2768_p10)
}
  0x3c   : > { %2604 = dma.hbm_to_vmem [thread:$0]  (!%p3051_p6), %s3554_s3, 16, %s3055_s30, [#allocation9]  }
  0x3d   : > { %s2772_s10 = scalar_lea.hbm %s3553_s2, 1024 }
  0x3e   : > { %p2773_p11 = scmp.ne.s32.totalorder %s3553_s2, %s2772_s10  ;;  %p2779_p0 = scmp.lt.u32.totalorder %s2772_s10, %s3553_s2 }
  0x40   : > { %p2775_p12 = pnand %p2773_p11, %p3067_p8 }
  0x42   : > { %p2776_p13 = pneg %p2775_p12 }
  0x44   : > { %p2781_p2 = pnand %p2779_p0, %p2776_p13 }
  0x46   : > { %2784 = shalt.err (!%p2781_p2)
}
  0x47   : > { %s2785_s30 = scalar_lea.vmem %s3057_s9, 1024  ;;  %p2793_p4 = scmp.lt.s32.totalorder %s3057_s9, %s3057_s9 }
  0x48   : > { %p2786_p5 = scmp.ne.s32.totalorder %s3057_s9, %s2785_s30  ;;  %p2794_p10 = scmp.lt.s32.totalorder %s2785_s30, %s2785_s30 }
  0x4a   : > { %p2788_p7 = pnand %p2786_p5, %p3067_p8  ;;  %p2795_p11 = por %p2794_p10, %p2793_p4 }
  0x4c   : > { %p2789_p9 = pneg %p2788_p7 }
  0x4e   : > { %p2796_p12 = pnand %p2795_p11, %p2789_p9 }
  0x50   : > { %2799 = shalt.err (!%p2796_p12)
}
  0x51   : > { %s2971_s16 = smov 64   ;;  %s2972_s26 = smov 4  }
  0x52   : > { %2601 = dma.hbm_to_vmem [thread:$0]  (!%p3051_p6), %s3553_s2, 1024, %s3057_s9, [#allocation6], %s2971_s16, %s2971_s16, %s2972_s26  }
  0x53   : > { %s2973_s25 = smov [#allocation10]   ;;  %s2974_s8 = smov [#allocation11]  }
  0x54   : > { %s237_s29 = sshll.u32 %s2973_s25, 4  ;;  %s248_s10 = sshll.u32 %s2974_s8, 4  ;;  %s238_s29 = int_to_ptr.vmem [resolvable:$true] %s237_s29  ;;  %s249_s10 = int_to_ptr.vmem [resolvable:$true] %s248_s10 }
  0x55   : > { %s2800_s13 = scalar_lea.hbm %s3555_s4, 16 }
  0x56   : > { %p2801_p13 = scmp.ne.s32.totalorder %s3555_s4, %s2800_s13  ;;  %p2807_p5 = scmp.lt.u32.totalorder %s2800_s13, %s3555_s4 }
  0x58   : > { %p2803_p0 = pnand %p2801_p13, %p3067_p8 }
  0x5a   : > { %p2804_p2 = pneg %p2803_p0 }
  0x5c   : > { %p2809_p7 = pnand %p2807_p5, %p2804_p2 }
  0x5e   : > { %2812 = shalt.err (!%p2809_p7)
}
  0x5f   : > { %s2813_s9 = scalar_lea.vmem %s238_s29, 16  ;;  %s2820_s16 = scalar_lea.vmem %s238_s29, 32 }
  0x60   : > { %p2814_p9 = scmp.ne.s32.totalorder %s238_s29, %s2813_s9  ;;  %p2821_p11 = scmp.lt.s32.totalorder %s238_s29, %s238_s29 }
  0x61   : > { %p2822_p12 = scmp.lt.s32.totalorder %s2820_s16, %s2813_s9 }
  0x62   : > { %p2816_p4 = pnand %p2814_p9, %p3067_p8 }
  0x63   : > { %p2823_p1 = por %p2822_p12, %p2821_p11 }
  0x64   : > { %p2817_p10 = pneg %p2816_p4 }
  0x66   : > { %p2824_p3 = pnand %p2823_p1, %p2817_p10 }
  0x68   : > { %2827 = shalt.err (!%p2824_p3)
}
  0x69   : > { %2607 = dma.hbm_to_vmem [thread:$0]  (!%p3051_p6), %s3555_s4, 16, %s238_s29, [#allocation9]  }
  0x6a   : > { %s2828_s18 = scalar_lea.hbm %s3556_s5, 16 }
  0x6b   : > { %p2829_p13 = scmp.ne.s32.totalorder %s3556_s5, %s2828_s18  ;;  %p2835_p3 = scmp.lt.u32.totalorder %s2828_s18, %s3556_s5 }
  0x6d   : > { %p2831_p0 = pnand %p2829_p13, %p3067_p8 }
  0x6f   : > { %p2832_p1 = pneg %p2831_p0 }
  0x71   : > { %p2837_p2 = pnand %p2835_p3, %p2832_p1 }
  0x73   : > { %2840 = shalt.err (!%p2837_p2)
}
  0x74   : > { %s2841_s13 = scalar_lea.vmem %s249_s10, 16  ;;  %s2848_s29 = scalar_lea.vmem %s249_s10, 32 }
  0x75   : > { %p2842_p5 = scmp.ne.s32.totalorder %s249_s10, %s2841_s13  ;;  %p2849_p4 = scmp.lt.s32.totalorder %s249_s10, %s249_s10 }
  0x76   : > { %p2850_p10 = scmp.lt.s32.totalorder %s2848_s29, %s2841_s13 }
  0x77   : > { %p2844_p7 = pnand %p2842_p5, %p3067_p8 }
  0x78   : > { %p2851_p11 = por %p2850_p10, %p2849_p4 }
  0x79   : > { %p2845_p9 = pneg %p2844_p7 }
  0x7b   : > { %p2852_p12 = pnand %p2851_p11, %p2845_p9 }
  0x7d   : > { %2855 = shalt.err (!%p2852_p12)
}
  0x7e   : > { %2610 = dma.hbm_to_vmem [thread:$0]  (!%p3051_p6), %s3556_s5, 16, %s249_s10, [#allocation12]  }
  0x7f   : > { %s2262_s15 = sadd.s32 4294967294, %s2964_s24   ;;  %s3176_s7 = sadd.s32 1, %s2964_s24  }
  0x80   : > { %s32_s9 = sadd.s32 1, %s2960_s23  ;;  %s29_s16 = ssub.s32 %s2964_s24, %s3176_s7 }
  0x81   : > { %p39_p8 = scmp.ne.s32.totalorder %s2960_s23, %s2956_s22  ;;  %p30_p13 = scmp.eq.s32.totalorder %s29_s16, 0 }
  0x82   : > { %p40_p0 = scmp.eq.s32.totalorder %s2964_s24, 0  ;;  %p45_p1 = scmp.ne.s32.totalorder %s2956_s22, %s2952_s21 }
  0x83   : > { %p174_p3 = scmp.eq.s32.totalorder %s3035_s27, 1  ;;  %p3566_p5 = scmp.eq.s32.totalorder %s3035_s27, 0 }
  0x84   : > { %s3188_s26 = scalar_select %p30_p13, %s2960_s23, %s32_s9  }
  0x85   : > { %p41_p2 = por %p40_p0, %p39_p8  ;;  %p3192_p7 = por %p3566_p5, %p45_p1 }
  0x86   : > { %p3196_p6 = por %p174_p3, %p39_p8  ;;  %p180_p9 = scmp.eq.s32.totalorder %s2262_s15, 1 }
  0x87   : > { %p2624_p4 = scmp.lt.s32.totalorder %s2964_s24, 2  ;;  %s259_s19 = sand.u32 1, %s2960_s23  }
  0x88   : > { %s3568_s10 = scalar_select %p3196_p6, 1, 0 }
  0x89   : > { %p3202_p10 = por %p180_p9, %p45_p1  ;;  %s2270_s18 = sshll.u32 %s259_s19, 6 }
  0x8a   : > { %s2333_s25 = sshll.u32 %s2964_s24, 10  ;;  %s263_s13 = scalar_lea.vmem [#allocation2], %s2270_s18 }
  0x8b   : > { %s3569_s20 = scalar_select %p3202_p10, 1, 0 }
  0x8c   : > { %s3210_s12 = scalar_lea.hbm %s3551_s0, %s2333_s25  ;;  %s270_s29 = sshll.u32 %s263_s13, 4  ;;  %s3216_s29 = int_to_ptr.vmem [resolvable:$true] %s270_s29 }
  0x8d   : > { %p3212_p11 = pnand %p2624_p4, %p41_p2  ;;  %s3218_s30 = scalar_lea.sflag [#allocation3], %s259_s19 }
  0x8e   : > { %s2856_s15 = scalar_lea.hbm %s3210_s12, 1024  ;;  %s2861_s18 = scalar_lea.hbm %s3551_s0, 2048 }
  0x8f   : > { %p2857_p12 = scmp.ne.s32.totalorder %s3210_s12, %s2856_s15  ;;  %p2858_p8 = pneg %p3212_p11 }
  0x90   : > { %p2862_p1 = scmp.lt.u32.totalorder %s3210_s12, %s3551_s0  ;;  %p2863_p3 = scmp.lt.u32.totalorder %s2861_s18, %s2856_s15 }
  0x91   : > { %p2859_p13 = pnand %p2858_p8, %p2857_p12  ;;  %p2865_p5 = scmp.lt.u32.totalorder %s2856_s15, %s3210_s12 }
  0x92   : > { %p2864_p2 = por %p2863_p3, %p2862_p1 }
  0x93   : > { %p2860_p0 = pneg %p2859_p13 }
  0x94   : > { %p2866_p9 = por %p2865_p5, %p2864_p2 }
  0x96   : > { %p2867_p4 = pnand %p2866_p9, %p2860_p0 }
  0x98   : > { %2870 = shalt.err (!%p2867_p4)
}
  0x99   : > { %s2871_s19 = scalar_lea.vmem %s3216_s29, 1024  ;;  %s2975_s11 = smov [#allocation2]  }
  0x9a   : > { %p2872_p12 = scmp.ne.s32.totalorder %s3216_s29, %s2871_s19  ;;  %s2876_s13 = sshll.u32 %s2975_s11, 4  ;;  %s2877_s13 = int_to_ptr.vmem [resolvable:$false] %s2876_s13 }
  0x9b   : > { %s2878_s9 = scalar_lea.vmem %s2877_s13, 2048  ;;  %p2879_p6 = scmp.lt.s32.totalorder %s3216_s29, %s2877_s13 }
  0x9c   : > { %p2874_p13 = pnand %p2872_p12, %p2858_p8  ;;  %p2880_p1 = scmp.lt.s32.totalorder %s2878_s9, %s2871_s19 }
  0x9e   : > { %p2875_p10 = pneg %p2874_p13  ;;  %p2881_p3 = por %p2880_p1, %p2879_p6 }
  0xa0   : > { %p2882_p2 = pnand %p2881_p3, %p2875_p10 }
  0xa2   : > { %2885 = shalt.err (!%p2882_p2)
}
  0xa3   : > { %s3571_s15 = smov 8   ;;  %s3572_s16 = smov 128  }
  0xa4   : > { %2614 = dma.hbm_to_vmem [thread:$0]  (!%p3212_p11), %s3210_s12, 1024, %s3216_s29, %s3218_s30, %s3572_s16, %s3572_s16, %s3571_s15  }
  0xa5   : > { %p3573_p8 = scmp.ne.s32.totalorder %s3563_s28, 0 }
  0xa6   : > { %s3252_s18 = sand.u32 (!%p3573_p8), 1, %s2956_s22  }
  0xa7   : > { %282 = sbr.rel (%p3573_p8) target bundleno = 1827 (0x723), region = 44  ;;  %s2274_s25 = sshll.u32 (!%p3573_p8), %s3252_s18, 6 }
  0xa8   : > { %s285_s8 = scalar_lea.sflag (!%p3573_p8), [#allocation3], %s3252_s18  ;;  %s3256_s19 = scalar_lea.vmem (!%p3573_p8), [#allocation2], %s2274_s25 }
  0xae   : > { %2931 = dma.done.wait (%p3192_p7), %s285_s8, 1024  }
  0xaf   : > { %2933 = vsyncadd (%p3192_p7), %s285_s8, 4294966272  ;;  %p3574_p6 = scmp.eq.s32.totalorder %s3035_s27, 0 }
  0xb1   : > { %2935 = dma.done.wait (%p3574_p6), [#allocation6], 1280   ;;  %p3575_p10 = pmov %p3574_p6 }
  0xb2   : > { %p3576_p11 = pmov %p3574_p6 }
  0xb3   : > { %2937 = vsyncadd (%p3575_p10), [#allocation6], 4294966016 }
  0xb4   : > { %2939 = dma.done.wait (%p3576_p11), [#allocation9], 32   ;;  %p3577_p0 = pmov %p3574_p6 }
  0xb6   : > { %2941 = vsyncadd (%p3577_p0), [#allocation9], 4294967264  ;;  %p3578_p5 = pmov %p3577_p0 }
  0xb7   : > { %p3579_p9 = pmov %p3577_p0 }
  0xb8   : > { %2943 = dma.done.wait (%p3578_p5), [#allocation12], 16  }
  0xb9   : > { %2945 = vsyncadd (%p3579_p9), [#allocation12], 4294967280  ;;  %vm379_vm0 = vcmask 64512   ;;  %v3275_v0 = vld [vmem:[%s3256_s19] sm:$0xff]  ;;  %v2281_v1 = vld [vmem:[#allocation8] ss:$0 sm:$0xff] }
  0xba   : > { %v3277_v2 = vld [vmem:[#allocation5] sm:$0xff]  ;;  %v371_v3 = vsub.f32 %v3275_v0, %v2281_v1  ;;  %v3283_v4 = vld [vmem:[%s3256_s19 + $0x8] sm:$0xff]  ;;  %v3286_v5 = vld [vmem:[%s3256_s19 + $0x10] sm:$0xff]  ;;  %vm1030_vm1 = vcmask 261120   ;;  %vm1906_vm2 = vcmask 1041409   ;;  %vm1909_vm3 = vcmask 1042434  }
  0xbb   : > { %2417 = vmatprep.mubr.msk.f32.mxu1 %vm379_vm0, %v3277_v2  ;;  %v3288_v6 = vld [vmem:[#allocation5 + $0x8] sm:$0x1]  ;;  %v372_v7 = vsub.f32 %v3283_v4, %v2281_v1  ;;  %v373_v8 = vsub.f32 %v3286_v5, %v2281_v1  ;;  %v3293_v9 = vld [vmem:[%s3256_s19 + $0x18] sm:$0xff]  ;;  %v2674_v10 = vld [vmem:[#allocation7] sm:$0xff]   ;;  %vm1912_vm4 = vcmask 1043459   ;;  %vm1915_vm5 = vcmask 1044484  }
  0xbc   : > { %2415 = vmatprep.subr.mxu1 %v371_v3  ;;  %v2675_v11 = vld [vmem:[#allocation7 + $0x8] sm:$0xff]   ;;  %v3300_v12 = vsel %vm1030_vm1, %v2674_v10, 0  ;;  %v374_v13 = vsub.f32 %v3293_v9, %v2281_v1  ;;  %2563 = vmatprep.subr.msk.bf16.mxu0 %vm1030_vm1, %v2674_v10  ;;  %v3305_v14 = vld [vmem:[%s3256_s19 + $0x20] sm:$0xff]  ;;  %v3315_v16 = vld [vmem:[%s3256_s19 + $0x28] sm:$0xff]  ;;  %vm1918_vm6 = vcmask 1045509   ;;  %vm1921_vm7 = vcmask 1046534  }
  0xbd   : > { %2416 = vmatpush3.msra.mxu1 %v371_v3  ;;  %2456 = vmatpush3.bf16.xpose.msra.mxu0 %v3300_v12  ;;  %v375_v15 = vsub.f32 %v3305_v14, %v2281_v1  ;;  %v3320_v17 = vsel %vm1030_vm1, %v2675_v11, 0  ;;  %v2676_v18 = vld [vmem:[#allocation7 + $0x10] sm:$0xff]   ;;  %v376_v19 = vsub.f32 %v3315_v16, %v2281_v1  ;;  %v3326_v20 = vld [vmem:[%s3256_s19 + $0x30] sm:$0xff]  ;;  %v3336_v22 = vld [vmem:[%s3256_s19 + $0x38] sm:$0xff]  ;;  %vm1924_vm8 = vcmask 1047559   ;;  %s2280_s28 = sshll.u32 %s3252_s18, 3 }
  0xbe   : > { %2418 = vmatmul.mubr.msk.f32.vlgmr.msra.gmra.mrb[0].mxu1 %vm379_vm0, %v3288_v6  ;;  %2420 = vmatprep.subr.mxu1 %v372_v7  ;;  %v377_v21 = vsub.f32 %v3326_v20, %v2281_v1  ;;  %v3341_v23 = vsel %vm1030_vm1, %v2676_v18, 0  ;;  %v2677_v24 = vld [vmem:[#allocation7 + $0x18] sm:$0xff]   ;;  %v378_v25 = vsub.f32 %v3336_v22, %v2281_v1  ;;  %v2678_v27 = vld [vmem:[#allocation7 + $0x20] sm:$0xff]   ;;  %v2679_v29 = vld [vmem:[#allocation7 + $0x28] sm:$0xff]   ;;  %vm2977_vm9 = vmmov 0   ;;  %s336_s17 = scalar_lea.vmem [#allocation13], %s2280_s28 }
  0xbf   : > { %2421 = vmatpush3.msra.mxu1 %v372_v7  ;;  %2422 = vmatprep.mubr.msk.f32.mxu1 %vm379_vm0, %v3277_v2  ;;  %v3355_v26 = vsel %vm1030_vm1, %v2677_v24, 0  ;;  %v3364_v28 = vsel %vm1030_vm1, %v2678_v27, 0  ;;  %v3369_v30 = vsel %vm1030_vm1, %v2679_v29, 0  ;;  %v2680_v31 = vld [vmem:[#allocation7 + $0x30] sm:$0xff]   ;;  %v2681_v33 = vld [vmem:[#allocation7 + $0x38] sm:$0xff]   ;;  %s2144_s12 = sshll.u32 %s336_s17, 4  ;;  %s3504_s12 = int_to_ptr.vmem [resolvable:$true] %s2144_s12 }
  0xc0   : > { %2425 = vmatprep.subr.mxu1 %v373_v8  ;;  %2564 = vmatprep.subr.msk.bf16.mxu0 %vm1030_vm1, %v2675_v11  ;;  %v3374_v32 = vsel %vm1030_vm1, %v2680_v31, 0  ;;  %v3379_v34 = vsel %vm1030_vm1, %v2681_v33, 0  ;;  %s2330_s29 = sshll.u32 %s3035_s27, 7  ;;  %s2131_s13 = scalar_lea.sflag [#allocation4], %s3252_s18 }
  0xc1   : > { %s3509_s11 = scalar_lea.hbm %s3557_s6, %s2330_s29  ;;  %s2886_s9 = scalar_lea.vmem %s3504_s12, 128 }
  0xc2   : > { %2423 = vmatmul.mubr.msk.f32.vlgmr.msra.gmra.mrb[2].mxu1 %vm379_vm0, %v3288_v6  ;;  %p2887_p7 = scmp.ne.s32.totalorder %s3504_s12, %s2886_s9  ;;  %p3580_p4 = scmp.ne.s32.totalorder %s3568_s10, 0 }
  0xc3   : > { %2426 = vmatpush3.msra.mxu1 %v373_v8  ;;  %2427 = vmatprep.mubr.msk.f32.mxu1 %vm379_vm0, %v3277_v2  ;;  %s2978_s27 = smov [#allocation13]  }
  0xc4   : > { %2430 = vmatprep.subr.mxu1 %v374_v13  ;;  %p2888_p12 = pnand %p2887_p7, %p3580_p4  ;;  %s2890_s15 = sshll.u32 %s2978_s27, 4  ;;  %s2891_s15 = int_to_ptr.vmem [resolvable:$false] %s2890_s15 }
  0xc5   : > { %2458 = vmatpush3.bf16.xpose.msra.mxu0 %v3320_v17  ;;  %s2892_s16 = scalar_lea.vmem %s2891_s15, 256  ;;  %p2893_p1 = scmp.lt.s32.totalorder %s3504_s12, %s2891_s15 }
  0xc6   : > { %2428 = vmatmul.mubr.msk.f32.vlgmr.msra.gmra.mrb[4].mxu1 %vm379_vm0, %v3288_v6  ;;  %2565 = vmatprep.subr.msk.bf16.mxu0 %vm1030_vm1, %v2676_v18  ;;  %p2889_p13 = pneg %p2888_p12  ;;  %p2894_p3 = scmp.lt.s32.totalorder %s2892_s16, %s2886_s9 }
  0xc7   : > { %2431 = vmatpush3.msra.mxu1 %v374_v13  ;;  %2432 = vmatprep.mubr.msk.f32.mxu1 %vm379_vm0, %v3277_v2 }
  0xc8   : > { %2435 = vmatprep.subr.mxu1 %v375_v15  ;;  %p2895_p2 = por %p2894_p3, %p2893_p1 }
  0xca   : > { %2433 = vmatmul.mubr.msk.f32.vlgmr.msra.gmra.mrb[6].mxu1 %vm379_vm0, %v3288_v6  ;;  %p2896_p8 = pnand %p2895_p2, %p2889_p13 }
  0xcb   : > { %2436 = vmatpush3.msra.mxu1 %v375_v15  ;;  %2437 = vmatprep.mubr.msk.f32.mxu1 %vm379_vm0, %v3277_v2 }
  0xcc   : > { %2440 = vmatprep.subr.mxu1 %v376_v19 }
  0xcd   : > { %2460 = vmatpush3.bf16.xpose.msra.mxu0 %v3341_v23 }
  0xce   : > { %2438 = vmatmul.mubr.msk.f32.vlgmr.msra.gmra.mrb[8].mxu1 %vm379_vm0, %v3288_v6  ;;  %2566 = vmatprep.subr.msk.bf16.mxu0 %vm1030_vm1, %v2677_v24 }
  0xcf   : > { %2441 = vmatpush3.msra.mxu1 %v376_v19  ;;  %2442 = vmatprep.mubr.msk.f32.mxu1 %vm379_vm0, %v3277_v2 }
  0xd0   : > { %2445 = vmatprep.subr.mxu1 %v377_v21 }
  0xd2   : > { %2443 = vmatmul.mubr.msk.f32.vlgmr.msra.gmra.mrb[10].mxu1 %vm379_vm0, %v3288_v6 }
  0xd3   : > { %2446 = vmatpush3.msra.mxu1 %v377_v21  ;;  %2447 = vmatprep.mubr.msk.f32.mxu1 %vm379_vm0, %v3277_v2 }
  0xd4   : > { %2450 = vmatprep.subr.mxu1 %v378_v25 }
  0xd5   : > { %2462 = vmatpush3.bf16.xpose.msra.mxu0 %v3355_v26 }
  0xd6   : > { %2448 = vmatmul.mubr.msk.f32.vlgmr.msra.gmra.mrb[12].mxu1 %vm379_vm0, %v3288_v6  ;;  %2567 = vmatprep.subr.msk.bf16.mxu0 %vm1030_vm1, %v2678_v27 }
  0xd7   : > { %2451 = vmatpush3.msra.mxu1 %v378_v25  ;;  %2452 = vmatprep.mubr.msk.f32.mxu1 %vm379_vm0, %v3277_v2 }
  0xd8   : > { %2479 = vmatprep.subr.bf16.mxu1 %v2674_v10 }
  0xda   : > { %2453 = vmatmul.mubr.msk.f32.vlgmr.msra.gmra.mrb[14].mxu1 %vm379_vm0, %v3288_v6 }
  0xdb   : > { %2480 = vmatpush3.bf16.msra.mxu1 %v2674_v10 }
  0xdc   : > { %2481 = vmatprep.subr.bf16.mxu1 %v2675_v11 }
  0xdd   : > { %2464 = vmatpush3.bf16.xpose.msra.mxu0 %v3364_v28 }
  0xde   : > { %2568 = vmatprep.subr.msk.bf16.mxu0 %vm1030_vm1, %v2679_v29 }
  0xdf   : > { %2482 = vmatpush3.bf16.msra.mxu1 %v2675_v11 }
  0xe0   : > { %2483 = vmatprep.subr.bf16.mxu1 %v2676_v18 }
  0xe3   : > { %2484 = vmatpush3.bf16.msra.mxu1 %v2676_v18 }
  0xe4   : > { %2485 = vmatprep.subr.bf16.mxu1 %v2677_v24 }
  0xe5   : > { %2466 = vmatpush3.bf16.xpose.msra.mxu0 %v3369_v30 }
  0xe6   : > { %2569 = vmatprep.subr.msk.bf16.mxu0 %vm1030_vm1, %v2680_v31 }
  0xe7   : > { %2486 = vmatpush3.bf16.msra.mxu1 %v2677_v24 }
  0xe8   : > { %2487 = vmatprep.subr.bf16.mxu1 %v2678_v27 }
  0xeb   : > { %2488 = vmatpush3.bf16.msra.mxu1 %v2678_v27 }
  0xec   : > { %2489 = vmatprep.subr.bf16.mxu1 %v2679_v29 }
  0xed   : > { %2468 = vmatpush3.bf16.xpose.msra.mxu0 %v3374_v32 }
  0xee   : > { %2570 = vmatprep.subr.msk.bf16.mxu0 %vm1030_vm1, %v2681_v33 }
  0xef   : > { %2490 = vmatpush3.bf16.msra.mxu1 %v2679_v29 }
  0xf0   : > { %2491 = vmatprep.subr.bf16.mxu1 %v2680_v31 }
  0xf3   : > { %2492 = vmatpush3.bf16.msra.mxu1 %v2680_v31 }
  0xf4   : > { %2493 = vmatprep.subr.bf16.mxu1 %v2681_v33 }
  0xf5   : > { %2470 = vmatpush3.bf16.xpose.msra.mxu0 %v3379_v34 }
  0xf7   : > { %2494 = vmatpush3.bf16.msra.mxu1 %v2681_v33 }
 0x191   : > { %v3382_v35 = vpop.f32.mrb[0].mxu1 }
 0x192   : > { %v452_v36 = vpop.f32.mrb[1].mxu1 }
 0x195   : > { %v3384_v37 = vpop.f32.mrb[2].mxu1 }
 0x196   : > { %v527_v38 = vpop.f32.mrb[3].mxu1 }
 0x197   : > { %v986_v39 = vpack.c.bf16 %v527_v38, %v452_v36 }
 0x199   : > { %v3386_v40 = vpop.f32.mrb[4].mxu1  ;;  %2471 = vmatprep.mubr.msk.bf16.mxu0 %vm1030_vm1, %v986_v39 }
 0x19a   : > { %v602_v41 = vpop.f32.mrb[5].mxu1 }
 0x19d   : > { %v3389_v42 = vpop.f32.mrb[6].mxu1 }
 0x19e   : > { %v677_v43 = vpop.f32.mrb[7].mxu1 }
 0x19f   : > { %v987_v44 = vpack.c.bf16 %v677_v43, %v602_v41 }
 0x1a1   : > { %2472 = vmatmul.mubr.msk.bf16.vlgmr.msra.gmra.mrb[0].mxu0 %vm1030_vm1, %v987_v44  ;;  %v3392_v45 = vpop.f32.mrb[8].mxu1 }
 0x1a2   : > { %v752_v46 = vpop.f32.mrb[9].mxu1 }
 0x1a5   : > { %v3394_v47 = vpop.f32.mrb[10].mxu1 }
 0x1a6   : > { %v827_v48 = vpop.f32.mrb[11].mxu1 }
 0x1a7   : > { %v988_v49 = vpack.c.bf16 %v827_v48, %v752_v46 }
 0x1a9   : > { %v3396_v50 = vpop.f32.mrb[12].mxu1  ;;  %2475 = vmatprep.mubr.msk.bf16.mxu0 %vm1030_vm1, %v988_v49 }
 0x1aa   : > { %v902_v51 = vpop.f32.mrb[13].mxu1 }
 0x1ad   : > { %v3399_v52 = vpop.f32.mrb[14].mxu1 }
 0x1ae   : > { %v977_v53 = vpop.f32.mrb[15].mxu1 }
 0x1af   : > { %v989_v54 = vpack.c.bf16 %v977_v53, %v902_v51 }
 0x1b1   : > { %2476 = vmatmul.mubr.msk.bf16.gmra.mrb[4].mxu0 %vm1030_vm1, %v989_v54 }
 0x274   : > { %v2473_v55 = vpop.f32.mrb[0].mxu0 }
 0x275   : > { %1136 = vmax.xlane.f32.xlu1 %v2473_v55  ;;  %v1101_v56 = vpop.f32.mrb[1].mxu0 }
 0x276   : > { %1132 = vmax.xlane.f32.xlu0 %v1101_v56  ;;  %v2474_v57 = vpop.f32.mrb[2].mxu0 }
 0x277   : > { %v1104_v58 = vpop.f32.mrb[3].mxu0 }
 0x279   : > { %1138 = vmax.xlane.f32.xlu1 %v2474_v57 }
 0x27a   : > { %1134 = vmax.xlane.f32.xlu0 %v1104_v58 }
 0x284   : > { %v2477_v59 = vpop.f32.mrb[4].mxu0 }
 0x285   : > { %v1117_v60 = vpop.f32.mrb[5].mxu0 }
 0x286   : > { %1140 = vmax.xlane.f32.xlu0 %v1117_v60  ;;  %v2478_v61 = vpop.f32.mrb[6].mxu0 }
 0x287   : > { %v1120_v62 = vpop.f32.mrb[7].mxu0 }
 0x288   : > { %1142 = vmax.xlane.f32.xlu1 %v1120_v62 }
 0x28a   : > { %1144 = vmax.xlane.f32.xlu0 %v2477_v59 }
 0x28c   : > { %1146 = vmax.xlane.f32.xlu1 %v2478_v61 }
 0x302   : > { %v1137_v63 = vpop.xlane.xlu1 %1136 }
 0x303   : > { %v1150_v1 = vsub.f32 %v2473_v55, %v1137_v63  ;;  %v1133_v3 = vpop.xlane.xlu0 %1132 }
 0x304   : > { %v1148_v7 = vsub.f32 %v1101_v56, %v1133_v3 }
 0x305   : > { %v1160_v8 = vmul.f32 1.442695, %v1150_v1 }
 0x306   : > { %v1156_v10 = vmul.f32 1.442695, %v1148_v7  ;;  %v1139_v11 = vpop.xlane.xlu1 %1138 }
 0x307   : > { %v1151_v13 = vsub.f32 %v2474_v57, %v1139_v11  ;;  %v1135_v15 = vpop.xlane.xlu0 %1134 }
 0x308   : > { %2682 = vpow2.f32 %v1156_v10  ;;  %v1149_v18 = vsub.f32 %v1104_v58, %v1135_v15 }
 0x309   : > { %v1162_v19 = vmul.f32 1.442695, %v1151_v13  ;;  %2684 = vpow2.f32 %v1160_v8 }
 0x30a   : > { %v1158_v21 = vmul.f32 1.442695, %v1149_v18 }
 0x30b   : > { %2686 = vpow2.f32 %v1162_v19 }
 0x30c   : > { %2688 = vpow2.f32 %v1158_v21 }
 0x312   : > { %v2683_v24 = vpop.eup %2682 }
 0x313   : > { %1172 = vadd.xlane.f32.xlu0 %v2683_v24  ;;  %v1141_v25 = vpop.xlane.xlu0 %1140  ;;  %v2685_v27 = vpop.eup %2684 }
 0x314   : > { %v1152_v29 = vsub.f32 %v1117_v60, %v1141_v25 }
 0x315   : > { %v2687_v31 = vpop.eup %2686  ;;  %v1143_v33 = vpop.xlane.xlu1 %1142 }
 0x316   : > { %v2689_v36 = vpop.eup %2688  ;;  %v1164_v38 = vmul.f32 1.442695, %v1152_v29  ;;  %v1153_v39 = vsub.f32 %v1120_v62, %v1143_v33  ;;  %v1189_v41 = vpack.c.bf16 %v2687_v31, %v2685_v27 }
 0x317   : > { %1176 = vadd.xlane.f32.xlu0 %v2685_v27  ;;  %v1145_v43 = vpop.xlane.xlu0 %1144  ;;  %1174 = vadd.xlane.f32.xlu1 %v2689_v36  ;;  %v1188_v44 = vpack.c.bf16 %v2689_v36, %v2683_v24 }
 0x318   : > { %2690 = vpow2.f32 %v1164_v38  ;;  %v1166_v46 = vmul.f32 1.442695, %v1153_v39  ;;  %v1154_v48 = vsub.f32 %v2477_v59, %v1145_v43 }
 0x319   : > { %2495 = vmatprep.mubr.bf16.mxu1 %v1188_v44  ;;  %v1147_v49 = vpop.xlane.xlu1 %1146 }
 0x31a   : > { %2692 = vpow2.f32 %v1166_v46  ;;  %v1168_v51 = vmul.f32 1.442695, %v1154_v48  ;;  %v1155_v53 = vsub.f32 %v2478_v61, %v1147_v49  ;;  %2496 = vmatmul.mubr.bf16.vlgmr.msra.gmra.mrb[16].mxu1 %v1189_v41 }
 0x31b   : > { %1178 = vadd.xlane.f32.xlu1 %v2687_v31 }
 0x31c   : > { %2694 = vpow2.f32 %v1168_v51  ;;  %v1170_v54 = vmul.f32 1.442695, %v1155_v53 }
 0x31e   : > { %2696 = vpow2.f32 %v1170_v54 }
 0x322   : > { %v2691_v55 = vpop.eup %2690 }
 0x323   : > { %1180 = vadd.xlane.f32.xlu0 %v2691_v55 }
 0x324   : > { %v2693_v56 = vpop.eup %2692 }
 0x325   : > { %1182 = vadd.xlane.f32.xlu1 %v2693_v56  ;;  %v1190_v57 = vpack.c.bf16 %v2693_v56, %v2691_v55 }
 0x326   : > { %v2695_v58 = vpop.eup %2694 }
 0x327   : > { %1184 = vadd.xlane.f32.xlu0 %v2695_v58  ;;  %2499 = vmatprep.mubr.bf16.mxu1 %v1190_v57 }
 0x328   : > { %v2697_v60 = vpop.eup %2696 }
 0x329   : > { %1186 = vadd.xlane.f32.xlu1 %v2697_v60  ;;  %v1191_v59 = vpack.c.bf16 %v2697_v60, %v2695_v58 }
 0x32b   : > { %2500 = vmatmul.mubr.bf16.gmra.mrb[20].mxu1 %v1191_v59 }
 0x32c   : > { %2505 = vmatprep.mubr.msk.f32.mxu1 %vm379_vm0, %v3277_v2 }
 0x3a0   : > { %v1173_v61 = vpop.xlane.xlu0 %1172 }
 0x3a1   : > { %v1265_v1 = vadd.f32 1e-08, %v1173_v61 }
 0x3a3   : > { %2698 = vrcp.f32 %v1265_v1 }
 0x3a4   : > { %v1175_v62 = vpop.xlane.xlu1 %1174  ;;  %v1177_v63 = vpop.xlane.xlu0 %1176 }
 0x3a5   : > { %v1267_v3 = vadd.f32 1e-08, %v1177_v63  ;;  %v1266_v7 = vadd.f32 1e-08, %v1175_v62 }
 0x3a7   : > { %2700 = vrcp.f32 %v1267_v3 }
 0x3a8   : > { %v1179_v8 = vpop.xlane.xlu1 %1178  ;;  %2702 = vrcp.f32 %v1266_v7 }
 0x3a9   : > { %v1268_v10 = vadd.f32 1e-08, %v1179_v8 }
 0x3ab   : > { %2704 = vrcp.f32 %v1268_v10 }
 0x3ad   : > { %v2699_v15 = vpop.eup %2698 }
 0x3b0   : > { %v1181_v11 = vpop.xlane.xlu0 %1180 }
 0x3b1   : > { %v2701_v21 = vpop.eup %2700  ;;  %v1269_v33 = vadd.f32 1e-08, %v1181_v11 }
 0x3b2   : > { %v1183_v18 = vpop.xlane.xlu1 %1182  ;;  %v2703_v27 = vpop.eup %2702 }
 0x3b3   : > { %v1270_v41 = vadd.f32 1e-08, %v1183_v18  ;;  %2706 = vrcp.f32 %v1269_v33 }
 0x3b4   : > { %v1185_v29 = vpop.xlane.xlu0 %1184 }
 0x3b5   : > { %v1271_v43 = vadd.f32 1e-08, %v1185_v29  ;;  %v2705_v46 = vpop.eup %2704  ;;  %2708 = vrcp.f32 %v1270_v41 }
 0x3b6   : > { %v1187_v48 = vpop.xlane.xlu1 %1186 }
 0x3b7   : > { %2710 = vrcp.f32 %v1271_v43 }
 0x3bd   : > { %v2707_v53 = vpop.eup %2706 }
 0x3ed   : > { %v2497_v13 = vpop.f32.mrb[16].mxu1 }
 0x3ee   : > { %v1234_v19 = vpop.f32.mrb[17].mxu1  ;;  %v1278_v36 = vmul.f32 %v2701_v21, %v2497_v13 }
 0x3ef   : > { %v1274_v24 = vmul.f32 %v2699_v15, %v1234_v19  ;;  %v2498_v25 = vpop.f32.mrb[18].mxu1 }
 0x3f0   : > { %v1237_v31 = vpop.f32.mrb[19].mxu1  ;;  %v1291_v49 = vsub.f32 %v3286_v5, %v1278_v36  ;;  %v1280_v51 = vmul.f32 %v2705_v46, %v2498_v25 }
 0x3f1   : > { %v1289_v38 = vsub.f32 %v3275_v0, %v1274_v24  ;;  %v1276_v39 = vmul.f32 %v2703_v27, %v1237_v31  ;;  %v1272_v0 = vadd.f32 1e-08, %v1187_v48 }
 0x3f3   : > { %v1290_v44 = vsub.f32 %v3283_v4, %v1276_v39  ;;  %2503 = vmatprep.subr.mxu1 %v1289_v38  ;;  %v1292_v4 = vsub.f32 %v3293_v9, %v1280_v51  ;;  %2712 = vrcp.f32 %v1272_v0  ;;  %v2709_v9 = vpop.eup %2708 }
 0x3f4   : > { %2504 = vmatpush3.msra.mxu1 %v1289_v38  ;;  %v2711_v57 = vpop.eup %2710 }
 0x3f5   : > { %2506 = vmatmul.mubr.msk.f32.vlgmr.msra.gmra.mrb[24].mxu1 %vm379_vm0, %v3288_v6  ;;  %2508 = vmatprep.subr.mxu1 %v1290_v44 }
 0x3f6   : > { %2509 = vmatpush3.msra.mxu1 %v1290_v44  ;;  %2510 = vmatprep.mubr.msk.f32.mxu1 %vm379_vm0, %v3277_v2 }
 0x3f7   : > { %2513 = vmatprep.subr.mxu1 %v1291_v49 }
 0x3f9   : > { %2511 = vmatmul.mubr.msk.f32.vlgmr.msra.gmra.mrb[26].mxu1 %vm379_vm0, %v3288_v6 }
 0x3fa   : > { %2514 = vmatpush3.msra.mxu1 %v1291_v49  ;;  %2515 = vmatprep.mubr.msk.f32.mxu1 %vm379_vm0, %v3277_v2 }
 0x3fb   : > { %2518 = vmatprep.subr.mxu1 %v1292_v4 }
 0x3fd   : > { %2516 = vmatmul.mubr.msk.f32.vlgmr.msra.gmra.mrb[28].mxu1 %vm379_vm0, %v3288_v6  ;;  %v2713_v63 = vpop.eup %2712 }
 0x3fe   : > { %2519 = vmatpush3.msra.mxu1 %v1292_v4  ;;  %v2501_v5 = vpop.f32.mrb[20].mxu1  ;;  %2520 = vmatprep.mubr.msk.f32.mxu1 %vm379_vm0, %v3277_v2 }
 0x3ff   : > { %v1250_v54 = vpop.f32.mrb[21].mxu1  ;;  %v1286_v60 = vmul.f32 %v2711_v57, %v2501_v5  ;;  %v2976_v5 = vmov 0.0  }
 0x400   : > { %v1282_v55 = vmul.f32 %v2707_v53, %v1250_v54  ;;  %v2502_v56 = vpop.f32.mrb[22].mxu1  ;;  %2543 = vmatprep.subr.bf16.mxu0 %v2976_v5  ;;  %2559 = vmatprep.mubr.msk.bf16.mxu0 %vm2977_vm9, %v2976_v5 }
 0x401   : > { %v1253_v58 = vpop.f32.mrb[23].mxu1  ;;  %2521 = vmatmul.mubr.msk.f32.vlgmr.msra.gmra.mrb[30].mxu1 %vm379_vm0, %v3288_v6  ;;  %v1295_v1 = vsub.f32 %v3326_v20, %v1286_v60  ;;  %v1288_v3 = vmul.f32 %v2713_v63, %v2502_v56  ;;  %2544 = vmatpush3.bf16.xpose.msra.mxu0 %v3300_v12 }
 0x402   : > { %v1293_v59 = vsub.f32 %v3305_v14, %v1282_v55  ;;  %v1284_v61 = vmul.f32 %v2709_v9, %v1253_v58  ;;  %2525 = vmatprep.mubr.msk.f32.mxu1 %vm379_vm0, %v3277_v2  ;;  %2545 = vmatprep.subr.bf16.mxu0 %v2976_v5 }
 0x403   : > { %v1296_v14 = vsub.f32 %v3336_v22, %v1288_v3 }
 0x404   : > { %v1294_v62 = vsub.f32 %v3315_v16, %v1284_v61  ;;  %2523 = vmatprep.subr.mxu1 %v1293_v59 }
 0x405   : > { %2524 = vmatpush3.msra.mxu1 %v1293_v59 }
 0x406   : > { %2526 = vmatmul.mubr.msk.f32.vlgmr.msra.gmra.mrb[32].mxu1 %vm379_vm0, %v3288_v6  ;;  %2528 = vmatprep.subr.mxu1 %v1294_v62 }
 0x407   : > { %2529 = vmatpush3.msra.mxu1 %v1294_v62  ;;  %2530 = vmatprep.mubr.msk.f32.mxu1 %vm379_vm0, %v3277_v2 }
 0x408   : > { %2533 = vmatprep.subr.mxu1 %v1295_v1 }
 0x409   : > { %2546 = vmatpush3.bf16.xpose.msra.mxu0 %v3320_v17 }
 0x40a   : > { %2531 = vmatmul.mubr.msk.f32.vlgmr.msra.gmra.mrb[34].mxu1 %vm379_vm0, %v3288_v6  ;;  %2547 = vmatprep.subr.bf16.mxu0 %v2976_v5 }
 0x40b   : > { %2534 = vmatpush3.msra.mxu1 %v1295_v1  ;;  %2535 = vmatprep.mubr.msk.f32.mxu1 %vm379_vm0, %v3277_v2 }
 0x40c   : > { %2538 = vmatprep.subr.mxu1 %v1296_v14 }
 0x40e   : > { %2536 = vmatmul.mubr.msk.f32.vlgmr.msra.gmra.mrb[36].mxu1 %vm379_vm0, %v3288_v6 }
 0x40f   : > { %2539 = vmatpush3.msra.mxu1 %v1296_v14  ;;  %2540 = vmatprep.mubr.msk.f32.mxu1 %vm379_vm0, %v3277_v2 }
 0x411   : > { %2548 = vmatpush3.bf16.xpose.msra.mxu0 %v3341_v23 }
 0x412   : > { %2541 = vmatmul.mubr.msk.f32.vlgmr.msra.gmra.mrb[38].mxu1 %vm379_vm0, %v3288_v6  ;;  %2549 = vmatprep.subr.bf16.mxu0 %v2976_v5 }
 0x419   : > { %2550 = vmatpush3.bf16.xpose.msra.mxu0 %v3355_v26 }
 0x41a   : > { %2551 = vmatprep.subr.bf16.mxu0 %v2976_v5 }
 0x421   : > { %2552 = vmatpush3.bf16.xpose.msra.mxu0 %v3364_v28 }
 0x422   : > { %2553 = vmatprep.subr.bf16.mxu0 %v2976_v5 }
 0x429   : > { %2554 = vmatpush3.bf16.xpose.msra.mxu0 %v3369_v30 }
 0x42a   : > { %2555 = vmatprep.subr.bf16.mxu0 %v2976_v5 }
 0x431   : > { %2556 = vmatpush3.bf16.xpose.msra.mxu0 %v3374_v32 }
 0x432   : > { %2557 = vmatprep.subr.bf16.mxu0 %v2976_v5 }
 0x439   : > { %2558 = vmatpush3.bf16.xpose.msra.mxu0 %v3379_v34 }
 0x4c8   : > { %v2507_v16 = vpop.f32.mrb[24].mxu1 }
 0x4c9   : > { %v3443_v20 = vadd.f32 %v2507_v16, %v3382_v35  ;;  %v1363_v22 = vpop.f32.mrb[25].mxu1 }
 0x4cc   : > { %v2512_v7 = vpop.f32.mrb[26].mxu1 }
 0x4cd   : > { %v3446_v8 = vadd.f32 %v2512_v7, %v3384_v37  ;;  %v1437_v10 = vpop.f32.mrb[27].mxu1 }
 0x4cf   : > { %v1905_v27 = vrot.slane %v3446_v8, 7 }
 0x4d0   : > { %v2517_v11 = vpop.f32.mrb[28].mxu1 }
 0x4d1   : > { %v3449_v13 = vadd.f32 %v2517_v11, %v3386_v40  ;;  %v1511_v15 = vpop.f32.mrb[29].mxu1  ;;  %v1907_v36 = vsel %vm1906_vm2, %v1905_v27, %v3443_v20 }
 0x4d3   : > { %v1908_v40 = vrot.slane %v3449_v13, 6 }
 0x4d4   : > { %v2522_v18 = vpop.f32.mrb[30].mxu1 }
 0x4d5   : > { %v3452_v2 = vadd.f32 %v2522_v18, %v3389_v42  ;;  %v1585_v6 = vpop.f32.mrb[31].mxu1  ;;  %v1910_v38 = vsel %vm1909_vm3, %v1908_v40, %v1907_v36 }
 0x4d7   : > { %v1911_v42 = vrot.slane %v3452_v2, 5 }
 0x4d9   : > { %v2527_v19 = vpop.f32.mrb[32].mxu1  ;;  %v1913_v43 = vsel %vm1912_vm4, %v1911_v42, %v1910_v38 }
 0x4da   : > { %v3455_v35 = vadd.f32 %v2527_v19, %v3392_v45  ;;  %v1659_v21 = vpop.f32.mrb[33].mxu1 }
 0x4dc   : > { %v1914_v45 = vrot.slane %v3455_v35, 4 }
 0x4dd   : > { %v2532_v24 = vpop.f32.mrb[34].mxu1 }
 0x4de   : > { %v1894_v37 = vadd.f32 %v2532_v24, %v3394_v47  ;;  %v1733_v25 = vpop.f32.mrb[35].mxu1  ;;  %v1916_v46 = vsel %vm1915_vm5, %v1914_v45, %v1913_v43  ;;  %v2326_v45 = vld [vmem:[#allocation10] ss:$0 sm:$0xff] }
 0x4e0   : > { %v1917_v47 = vrot.slane %v1894_v37, 3 }
 0x4e1   : > { %v2537_v29 = vpop.f32.mrb[36].mxu1 }
 0x4e2   : > { %v1895_v31 = vadd.f32 %v2537_v29, %v3396_v50  ;;  %v1807_v33 = vpop.f32.mrb[37].mxu1  ;;  %v1919_v49 = vsel %vm1918_vm6, %v1917_v47, %v1916_v46  ;;  %v2327_v46 = vld [vmem:[#allocation11] ss:$0 sm:$0xff] }
 0x4e4   : > { %v1920_v39 = vrot.slane %v1895_v31, 2 }
 0x4e5   : > { %v2542_v41 = vpop.f32.mrb[38].mxu1 }
 0x4e6   : > { %v1896_v44 = vadd.f32 %v2542_v41, %v3399_v52  ;;  %v1881_v50 = vpop.f32.mrb[39].mxu1  ;;  %v1922_v51 = vsel %vm1921_vm7, %v1920_v39, %v1919_v49 }
 0x4e8   : > { %v1923_v48 = vrot.slane %v1896_v44, 1 }
 0x4ea   : > { %v1925_v0 = vsel %vm1924_vm8, %v1923_v48, %v1922_v51 }
 0x4eb   : > { %v1927_v4 = vsel %vm1030_vm1, %v1925_v0, 0.0 }
 0x4ec   : > { %1928 = vadd.xlane.f32.xlu0 %v1927_v4 }
 0x579   : > { %v1929_v12 = vpop.xlane.xlu0 %1928 }
 0x57a   : > { %v1931_v17 = vmul.f32 0.03125, %v1929_v12 }
 0x57c   : > { %v1933_v52 = vrot.slane %v1931_v17, 1  ;;  %v1934_v53 = vrot.slane %v1931_v17, 2  ;;  %v1935_v23 = vrot.slane %v1931_v17, 3  ;;  %v1936_v54 = vrot.slane %v1931_v17, 4 }
 0x57d   : > { %v1937_v9 = vrot.slane %v1931_v17, 5  ;;  %v1938_v26 = vrot.slane %v1931_v17, 6  ;;  %v1939_v55 = vrot.slane %v1931_v17, 7  ;;  %v1948_v28 = vsub.f32 %v3443_v20, %v1931_v17 }
 0x57e   : > { %v1949_v56 = vsub.f32 %v3446_v8, %v1933_v52  ;;  %v1950_v30 = vsub.f32 %v3449_v13, %v1934_v53  ;;  %v1951_v32 = vsub.f32 %v3452_v2, %v1935_v23  ;;  %v1952_v57 = vsub.f32 %v3455_v35, %v1936_v54 }
 0x57f   : > { %v1953_v34 = vsub.f32 %v1894_v37, %v1937_v9  ;;  %v1954_v58 = vsub.f32 %v1895_v31, %v1938_v26  ;;  %v1955_v60 = vsub.f32 %v1896_v44, %v1939_v55  ;;  %v1956_v1 = vmul.f32 %v1948_v28, %v1948_v28 }
 0x580   : > { %v1957_v59 = vmul.f32 %v1949_v56, %v1949_v56  ;;  %v1958_v61 = vmul.f32 %v1950_v30, %v1950_v30  ;;  %v1959_v62 = vmul.f32 %v1951_v32, %v1951_v32  ;;  %v1960_v63 = vmul.f32 %v1952_v57, %v1952_v57 }
 0x581   : > { %v1961_v3 = vmul.f32 %v1953_v34, %v1953_v34  ;;  %v1962_v20 = vmul.f32 %v1954_v58, %v1954_v58  ;;  %v1963_v22 = vmul.f32 %v1955_v60, %v1955_v60 }
 0x582   : > { %v1972_v14 = vrot.slane %v1957_v59, 7  ;;  %v1974_v16 = vrot.slane %v1958_v61, 6  ;;  %v1976_v8 = vrot.slane %v1959_v62, 5  ;;  %v1978_v11 = vrot.slane %v1960_v63, 4 }
 0x583   : > { %v1980_v15 = vrot.slane %v1961_v3, 3  ;;  %v1982_v2 = vrot.slane %v1962_v20, 2  ;;  %v1984_v19 = vrot.slane %v1963_v22, 1 }
 0x584   : > { %v1973_v7 = vsel %vm1906_vm2, %v1972_v14, %v1956_v1 }
 0x585   : > { %v1975_v10 = vsel %vm1909_vm3, %v1974_v16, %v1973_v7 }
 0x586   : > { %v1977_v13 = vsel %vm1912_vm4, %v1976_v8, %v1975_v10 }
 0x587   : > { %v1979_v18 = vsel %vm1915_vm5, %v1978_v11, %v1977_v13 }
 0x588   : > { %v1981_v6 = vsel %vm1918_vm6, %v1980_v15, %v1979_v18 }
 0x589   : > { %v1983_v35 = vsel %vm1921_vm7, %v1982_v2, %v1981_v6 }
 0x58a   : > { %v1985_v21 = vsel %vm1924_vm8, %v1984_v19, %v1983_v35 }
 0x58b   : > { %v1987_v24 = vsel %vm1030_vm1, %v1985_v21, 0.0 }
 0x58c   : > { %1988 = vadd.xlane.f32.xlu1 %v1987_v24 }
 0x619   : > { %v1989_v37 = vpop.xlane.xlu1 %1988 }
 0x61a   : > { %v1990_v25 = vmul.f32 0.03125, %v1989_v37 }
 0x61c   : > { %v1991_v27 = vadd.f32 1e-05, %v1990_v25 }
 0x61e   : > { %2714 = vrsqrt.f32 %v1991_v27 }
 0x628   : > { %v2715_v40 = vpop.eup %2714 }
 0x629   : > { %v1994_v29 = vrot.slane %v2715_v40, 1  ;;  %v1995_v42 = vrot.slane %v2715_v40, 2  ;;  %v1996_v31 = vrot.slane %v2715_v40, 3  ;;  %v1997_v33 = vrot.slane %v2715_v40, 4 }
 0x62a   : > { %v1998_v36 = vrot.slane %v2715_v40, 5  ;;  %v1999_v47 = vrot.slane %v2715_v40, 6  ;;  %v2000_v38 = vrot.slane %v2715_v40, 7  ;;  %v2009_v39 = vmul.f32 %v2715_v40, %v1948_v28 }
 0x62b   : > { %v2010_v41 = vmul.f32 %v1994_v29, %v1949_v56  ;;  %v2011_v43 = vmul.f32 %v1995_v42, %v1950_v30  ;;  %v2012_v44 = vmul.f32 %v1996_v31, %v1951_v32  ;;  %v2013_v50 = vmul.f32 %v1997_v33, %v1952_v57 }
 0x62c   : > { %v2014_v48 = vmul.f32 %v1998_v36, %v1953_v34  ;;  %v2015_v49 = vmul.f32 %v1999_v47, %v1954_v58  ;;  %v2016_v51 = vmul.f32 %v2000_v38, %v1955_v60  ;;  %v2024_v0 = vmul.f32 %v2326_v45, %v2009_v39 }
 0x62d   : > { %v2025_v4 = vmul.f32 %v2326_v45, %v2010_v41  ;;  %v2026_v5 = vmul.f32 %v2326_v45, %v2011_v43  ;;  %v2027_v12 = vmul.f32 %v2326_v45, %v2012_v44  ;;  %v2028_v17 = vmul.f32 %v2326_v45, %v2013_v50 }
 0x62e   : > { %v2029_v52 = vmul.f32 %v2326_v45, %v2014_v48  ;;  %v2030_v53 = vmul.f32 %v2326_v45, %v2015_v49  ;;  %v2031_v23 = vmul.f32 %v2326_v45, %v2016_v51  ;;  %v2039_v54 = vadd.f32 %v2327_v46, %v2024_v0 }
 0x62f   : > { %v2040_v9 = vadd.f32 %v2327_v46, %v2025_v4  ;;  %v2041_v26 = vadd.f32 %v2327_v46, %v2026_v5  ;;  %v2042_v55 = vadd.f32 %v2327_v46, %v2027_v12  ;;  %v2043_v28 = vadd.f32 %v2327_v46, %v2028_v17 }
 0x630   : > { %v2044_v56 = vadd.f32 %v2327_v46, %v2029_v52  ;;  %v2045_v30 = vadd.f32 %v2327_v46, %v2030_v53  ;;  %v2046_v32 = vadd.f32 %v2327_v46, %v2031_v23  ;;  %v2047_v57 = vpack.c.bf16 %v2039_v54, %v2039_v54 }
 0x631   : > { %v2048_v34 = vpack.c.bf16 %v2040_v9, %v2040_v9  ;;  %v2049_v58 = vpack.c.bf16 %v2041_v26, %v2041_v26  ;;  %v2050_v60 = vpack.c.bf16 %v2042_v55, %v2042_v55  ;;  %v2051_v59 = vpack.c.bf16 %v2043_v28, %v2043_v28 }
 0x632   : > { %v2052_v61 = vpack.c.bf16 %v2044_v56, %v2044_v56  ;;  %v2053_v62 = vpack.c.bf16 %v2045_v30, %v2045_v30  ;;  %v2054_v63 = vpack.c.bf16 %v2046_v32, %v2046_v32  ;;  %v2063_v20 = vunpack.c.l.b16 %v2047_v57 }
 0x633   : > { %v2064_v1 = vunpack.c.l.b16 %v2048_v34  ;;  %v2065_v3 = vunpack.c.l.b16 %v2049_v58  ;;  %v2066_v14 = vunpack.c.l.b16 %v2050_v60  ;;  %v2067_v16 = vunpack.c.l.b16 %v2051_v59 }
 0x634   : > { %v2068_v22 = vunpack.c.l.b16 %v2052_v61  ;;  %v2069_v10 = vunpack.c.l.b16 %v2053_v62  ;;  %v2070_v11 = vunpack.c.l.b16 %v2054_v63 }
 0x635   : > { %v2071_v7 = vrot.slane %v2064_v1, 7  ;;  %v2073_v8 = vrot.slane %v2065_v3, 6  ;;  %v2075_v15 = vrot.slane %v2066_v14, 5  ;;  %v2077_v2 = vrot.slane %v2067_v16, 4 }
 0x636   : > { %v2079_v19 = vrot.slane %v2068_v22, 3  ;;  %v2081_v21 = vrot.slane %v2069_v10, 2  ;;  %v2083_v37 = vrot.slane %v2070_v11, 1 }
 0x637   : > { %v2072_v13 = vsel %vm1906_vm2, %v2071_v7, %v2063_v20 }
 0x638   : > { %v2074_v18 = vsel %vm1909_vm3, %v2073_v8, %v2072_v13 }
 0x639   : > { %v2076_v6 = vsel %vm1912_vm4, %v2075_v15, %v2074_v18 }
 0x63a   : > { %v2078_v35 = vsel %vm1915_vm5, %v2077_v2, %v2076_v6 }
 0x63b   : > { %v2080_v24 = vsel %vm1918_vm6, %v2079_v19, %v2078_v35 }
 0x63c   : > { %v2082_v25 = vsel %vm1921_vm7, %v2081_v21, %v2080_v24 }
 0x63d   : > { %v2084_v27 = vsel %vm1924_vm8, %v2083_v37, %v2082_v25 }
 0x63e   : > { %v2085_v40 = vpack.c.b16 %v2084_v27, %v2084_v27 }
 0x640   : > { %2560 = vmatmul.mubr.msk.bf16.vlgmr.msra.gmra.mrb[8].mxu0 %vm1030_vm1, %v2085_v40 }
 0x713   : > { %v2123_v29 = vpop.f32.mrb[8].mxu0 }
 0x714   : > { %2129 = vst [vmem:[%s336_s17] sm:$0xff] %v2123_v29  ;;  %v2561_v42 = vpop.f32.mrb[9].mxu0 }
 0x715   : > { %v2126_v31 = vpop.f32.mrb[10].mxu0 }
 0x716   : > { %2899 = shalt.err (!%p2896_p8)
}
 0x717   : > { %s2900_s18 = scalar_lea.hbm %s3509_s11, 128  ;;  %s2904_s19 = scalar_lea.hbm %s3557_s6, 256 }
 0x718   : > { %p2901_p6 = scmp.ne.s32.totalorder %s3509_s11, %s2900_s18  ;;  %p2905_p0 = scmp.lt.u32.totalorder %s3509_s11, %s3557_s6 }
 0x719   : > { %p2906_p5 = scmp.lt.u32.totalorder %s2904_s19, %s2900_s18  ;;  %p2908_p7 = scmp.lt.u32.totalorder %s2900_s18, %s3509_s11 }
 0x71a   : > { %p2902_p10 = pnand %p2901_p6, %p3580_p4 }
 0x71b   : > { %p2907_p9 = por %p2906_p5, %p2905_p0 }
 0x71c   : > { %p2903_p11 = pneg %p2902_p10 }
 0x71d   : > { %p2909_p12 = por %p2908_p7, %p2907_p9 }
 0x71f   : > { %p2910_p13 = pnand %p2909_p12, %p2903_p11 }
 0x721   : > { %2913 = shalt.err (!%p2910_p13)
}
 0x722   : > { %2593 = dma.vmem_to_hbm [thread:$0]  (%p3580_p4), %s3504_s12, 128, %s3509_s11, %s2131_s13   ;;  %v2562_v33 = vpop.f32.mrb[11].mxu0 }
 0x723 PF: > { %s2156_s29 = sand.u32 1, %s2952_s21   ;;  %p3581_p1 = scmp.ne.s32.totalorder %s3569_s20, 0 }
 0x724   : > { %p3582_p3 = scmp.ge.s32.totalorder %s2964_s24, 2  ;;  %s2157_s14 = scalar_lea.sflag [#allocation4], %s2156_s29 }
 0x726   : > { %p2616_p2 = pnand %p3582_p3, %p3581_p1 }
 0x728   : > { %2947 = dma.done.wait (!%p2616_p2), %s2157_s14, 128  }
 0x729   : > { %2949 = vsyncadd (!%p2616_p2), %s2157_s14, 4294967168  ;;  %p22_p8 = scmp.ge.s32.totalorder %s3176_s7, 4   ;;  %s3583_s21 = smov %s2956_s22 }
 0x72a   : > { %s3584_s22 = smov %s2960_s23  ;;  %s3585_s23 = smov %s3188_s26 }
 0x72b   : > { %s3586_s24 = smov %s3176_s7  ;;  %24 = sbr.rel (!%p22_p8) target bundleno = 8 (0x8), region = 109 }
 0x732   :  { %2162 = vsyncpa [#allocation3], 1 }
 0x733   :  { %2164 = vsyncpa [#allocation3 + $0x1], 1 }
 0x734   :  { %2165 = vsyncpa [#allocation6], 1 }
 0x735   :  { %2166 = vsyncpa [#allocation9], 1 }
 0x736   :  { %2167 = vsyncpa [#allocation12], 1 }
 0x737   :  { %2168 = vsyncpa [#allocation4], 1 }
 0x738   :  { %2170 = vsyncpa [#allocation4 + $0x1], 1 }

</bundles_post_ra>
